<compile_context>
chip_gen: v7x
topology: tpu7x:2x2x1
jax: 0.10.0
libtpu: 0.0.40
codegen_flags: <defaults>
</compile_context>

<pallas_src>
import jax
import jax.numpy as jnp
from jax.experimental import pallas as pl
from jax.experimental.pallas import tpu as pltpu

_PAD = 8          # activation payload starts at this (sublane-aligned) row


def dpcnn_kernel(ids_ref,            # SMEM (B*S,) int32   (scalar prefetch)
                 table_ref,          # VMEM (V, 1, E) bf16
                 wr_ref,             # VMEM (3, E, C) bf16  (region conv, per tap)
                 br_ref,             # VMEM (1, C) f32
                 wc_ref,             # VMEM (3, C, C) bf16  (shared conv3, per tap)
                 bc_ref,             # VMEM (1, C) f32
                 wl_ref,             # VMEM (C, n_cls) bf16
                 bl_ref,             # VMEM (1, n_cls) f32
                 logit_ref,          # out  (Bb, 1, n_cls) f32
                 feat_ref,           # out  (Bb, 1, C) f32
                 emb_sc,             # VMEM scratch (Bb, S, E) f32
                 xpad_ref):          # VMEM scratch (Bb, P_rows, C) f32
    Bb, S, E = emb_sc.shape
    C = xpad_ref.shape[-1]
    n_cls = logit_ref.shape[-1]
    T = S - 2                                    # length after the region conv

    # ---- fused embedding gather (ids in SMEM, table rows in VMEM) ----------
    base = pl.program_id(0) * (Bb * S)
    for b in range(Bb):
        for t in range(S):
            tok = ids_ref[base + b * S + t]                       # dynamic i32
            row = table_ref[tok].astype(jnp.float32)              # (1, E)
            emb_sc[pl.ds(b, 1), pl.ds(t, 1), :] = row.reshape(1, 1, E)

    # Zero only the two pad rows that are ever read (opt 4): left pad at
    # row _PAD-1 (never overwritten; data stores start at _PAD) and the
    # initial right pad at row _PAD+T.  Everything else is never read.
    zrow = jnp.zeros((Bb, 1, C), jnp.float32)
    xpad_ref[:, _PAD - 1:_PAD, :] = zrow
    xpad_ref[:, _PAD + T:_PAD + T + 1, :] = zrow

    br = br_ref[...]                                              # (1, C) f32
    bc = bc_ref[...]                                              # (1, C) f32

    def tap_dot(x3, w_ref, t_len):
        # x3: (Bb, t_len + 2, Cin) value (already relu'd where needed).
        # Width-3 conv as 3 per-tap bf16 matmuls, batch collapsed into M.
        cin = x3.shape[-1]

        def lhs(k):
            return (x3[:, k:k + t_len, :]
                    .reshape(Bb * t_len, cin)
                    .astype(jnp.bfloat16))

        acc = jnp.dot(lhs(0), w_ref[0], preferred_element_type=jnp.float32)
        for k in (1, 2):
            acc = acc + jnp.dot(lhs(k), w_ref[k],
                                preferred_element_type=jnp.float32)
        return acc                                    # (Bb*t_len, Cout) f32

    # ---- region embedding: Conv2d(1, C, (3, E)) -----------------------------
    emb = emb_sc[...]                                             # (Bb, S, E)
    x = (tap_dot(emb, wr_ref, T) + br).reshape(Bb, T, C)
    xpad_ref[:, _PAD:_PAD + T, :] = x                  # aligned payload store

    def conv3(t_len):
        # pad(1,1) -> relu -> Conv1d(C, C, 3), read from the padded scratch.
        xp = jnp.maximum(xpad_ref[:, _PAD - 1:_PAD + t_len + 1, :], 0.0)
        y = tap_dot(xp, wc_ref, t_len) + bc
        return y.reshape(Bb, t_len, C)

    # ---- two pre-block (pad -> relu -> conv3) layers -------------------------
    x_cur = conv3(T)
    xpad_ref[:, _PAD:_PAD + T, :] = x_cur
    x_cur = conv3(T)
    if T >= 2:
        xpad_ref[:, _PAD:_PAD + T, :] = x_cur

    # ---- repeated DPCNN blocks until length == 1 (statically unrolled) ------
    while T >= 2:
        Tn = (T - 2) // 2 + 1          # length after pad(1,0) + maxpool(3, s=2)
        # max-pool window t = max(rows 2t, 2t+1, 2t+2) of [0-pad ; x]:
        # three stride-2 sublane loads + two element-wise maxima.
        a = xpad_ref[:, pl.ds(_PAD - 1, Tn, stride=2), :]
        b_ = xpad_ref[:, pl.ds(_PAD, Tn, stride=2), :]
        c_ = xpad_ref[:, pl.ds(_PAD + 1, Tn, stride=2), :]
        px = jnp.maximum(jnp.maximum(a, b_), c_)                  # (Bb, Tn, C)

        xpad_ref[:, _PAD:_PAD + Tn, :] = px
        xpad_ref[:, _PAD + Tn:_PAD + Tn + 1, :] = zrow   # fresh right zero pad

        y = conv3(Tn)
        xpad_ref[:, _PAD:_PAD + Tn, :] = y
        y = conv3(Tn)
        x_cur = y + px                                            # residual add
        T = Tn
        if T >= 2:                     # opt 9: skip the last block's writeback
            xpad_ref[:, _PAD:_PAD + T, :] = x_cur

    # ---- classifier head -----------------------------------------------------
    feat_ref[...] = x_cur                                         # (Bb, 1, C)
    feat2d = x_cur.reshape(Bb, C)
    logits = jnp.dot(feat2d.astype(jnp.bfloat16), wl_ref[...],
                     preferred_element_type=jnp.float32) + bl_ref[...]
    logit_ref[...] = logits.reshape(Bb, 1, n_cls)


def _vmem_capacity_bytes():
    try:
        return int(pltpu.get_tpu_info().vmem_capacity_bytes)
    except Exception:
        return 64 * 1024 * 1024        # conservative (v7x per-TensorCore)


def _auto_block_b(B, per_b_bytes, fixed_bytes, budget, min_steps=4):
    """Largest divisor of B that fits the VMEM budget and leaves >= min(4, B)
    grid steps (>= 2 per TensorCore on v7x, and enough steps to pipeline)."""
    divisors = [d for d in range(1, B + 1) if B % d == 0]
    target = min(min_steps, B)
    fitting = [d for d in divisors if fixed_bytes + d * per_b_bytes <= budget]
    if not fitting:
        return 1
    with_steps = [d for d in fitting if B // d >= target]
    return max(with_steps) if with_steps else 1


def dpcnn_forward(token_ids, params, *, block_b=None):
    """token_ids: (seq_len, batch) int32.

    params = (embed_table (V, E), wr (3, E, C), br (1, C), wc (3, C, C),
              bc (1, C), wl (C, n_classes), bl (1, n_classes))
    (Conv / linear weights in tap-major, channels-last layout, i.e. the
     PyTorch weights transposed once on the host.)
    Returns (logits (B, n_classes), features (B, C)).
    """
    embed_table, wr, br, wc, bc, wl, bl = params
    S, B = token_ids.shape
    V, E = embed_table.shape
    C = wc.shape[-1]
    n_classes = wl.shape[1]
    assert S >= 3, "DPCNN needs seq_len >= 3 (region conv is width 3)"

    # Scratch rows: payload at [8, 8+T), left pad row 7, right pad row 8+T.
    P_rows = -(-(S + 7) // 8) * 8

    # bf16 MXU operands (accumulation stays f32 in-kernel); f32 biases.
    table3 = embed_table.astype(jnp.bfloat16).reshape(V, 1, E)
    wr_b = wr.astype(jnp.bfloat16)
    wc_b = wc.astype(jnp.bfloat16)
    wl_b = wl.astype(jnp.bfloat16)
    br_f = br.astype(jnp.float32)
    bc_f = bc.astype(jnp.float32)
    bl_f = bl.astype(jnp.float32)

    # Token ids, batch-major flattened, scalar-prefetched into SMEM.
    ids_flat = token_ids.T.reshape(-1).astype(jnp.int32)          # (B*S,)

    # ---- VMEM budgeting & batch-block pick (opts 5, 6) ----------------------
    cap = _vmem_capacity_bytes()
    per_b = (S * E + P_rows * C) * 4 + 2 * (n_classes + C) * 4    # scratch+outs
    fixed = (2 * (V * E + 3 * E * C + 3 * C * C + C * n_classes) * 2
             + 2 * (2 * C + n_classes) * 4 + (2 << 20))           # weights+slack
    budget = int(0.7 * cap)
    Bb = _auto_block_b(B, per_b, fixed, budget) if block_b is None else block_b
    assert B % Bb == 0, "block_b must divide the batch size"
    vmem_limit = int(min(cap - (4 << 20),
                         max(32 << 20, 2 * (fixed + Bb * per_b))))

    kernel = pl.pallas_call(
        dpcnn_kernel,
        out_shape=(jax.ShapeDtypeStruct((B, 1, n_classes), jnp.float32),
                   jax.ShapeDtypeStruct((B, 1, C), jnp.float32)),
        grid_spec=pltpu.PrefetchScalarGridSpec(
            num_scalar_prefetch=1,
            grid=(B // Bb,),
            in_specs=[
                pl.BlockSpec((V, 1, E), lambda i, ids: (0, 0, 0)),       # table
                pl.BlockSpec((3, E, C), lambda i, ids: (0, 0, 0)),       # region W
                pl.BlockSpec((1, C), lambda i, ids: (0, 0)),             # region b
                pl.BlockSpec((3, C, C), lambda i, ids: (0, 0, 0)),       # conv3 W
                pl.BlockSpec((1, C), lambda i, ids: (0, 0)),             # conv3 b
                pl.BlockSpec((C, n_classes), lambda i, ids: (0, 0)),     # linear W
                pl.BlockSpec((1, n_classes), lambda i, ids: (0, 0)),     # linear b
            ],
            out_specs=[
                pl.BlockSpec((Bb, 1, n_classes), lambda i, ids: (i, 0, 0)),
                pl.BlockSpec((Bb, 1, C), lambda i, ids: (i, 0, 0)),
            ],
            scratch_shapes=[
                pltpu.VMEM((Bb, S, E), jnp.float32),       # gathered embeddings
                pltpu.VMEM((Bb, P_rows, C), jnp.float32),  # padded activations
            ],
        ),
        compiler_params=pltpu.CompilerParams(
            dimension_semantics=("parallel",),
            vmem_limit_bytes=vmem_limit),
    )
    logits3, feats3 = kernel(ids_flat, table3, wr_b, br_f, wc_b, bc_f, wl_b, bl_f)
    return logits3.reshape(B, n_classes), feats3.reshape(B, C)


def dpcnn_reference(token_ids, params):
    """Pure-JAX f32 reference of the PyTorch forward (per-tap convs)."""
    embed_table, wr, br, wc, bc, wl, bl = params
    S, B = token_ids.shape
    C = wc.shape[-1]

    ids = token_ids.T
    emb = (jnp.take(embed_table, ids, axis=0)
           .astype(jnp.bfloat16).astype(jnp.float32))   # same table rounding

    def pad_t(x, left, right):
        return jnp.pad(x, ((0, 0), (left, right), (0, 0)))

    def conv_region(x):                       # (B, S, E) -> (B, S-2, C)
        L = x.shape[1] - 2
        acc = jnp.zeros((B, L, C), jnp.float32)
        for k in range(3):
            acc = acc + jnp.einsum('bte,ec->btc', x[:, k:k + L, :], wr[k])
        return acc + br

    def conv3(x):                             # 'valid' width-3 conv over axis 1
        L = x.shape[1] - 2
        acc = jnp.zeros((B, L, C), jnp.float32)
        for k in range(3):
            acc = acc + jnp.einsum('btc,cd->btd', x[:, k:k + L, :], wc[k])
        return acc + bc

    def maxpool3s2(x):                        # kernel 3, stride 2, over axis 1
        n = (x.shape[1] - 3) // 2 + 1
        return jnp.stack([jnp.max(x[:, 2 * t:2 * t + 3, :], axis=1)
                          for t in range(n)], axis=1)

    x = conv_region(emb)
    for _ in range(2):
        x = conv3(jax.nn.relu(pad_t(x, 1, 1)))
    while x.shape[1] >= 2:
        px = maxpool3s2(pad_t(x, 1, 0))
        y = px
        for _ in range(2):
            y = conv3(jax.nn.relu(pad_t(y, 1, 1)))
        x = y + px
    feat = x[:, 0, :]
    logits = feat @ wl + bl
    return logits, feat


if __name__ == "__main__":
    # Small config consistent with the module's __init__ / forward.
    num_tokens = 50      # len(word2idx)
    emsize = 32          # config.emsize
    kernel_num = 32      # config.kernel_num
    n_classes = 4        # config.class_number
    seq_len = 8          # sentence length (first axis of the input)
    batch = 2

    key = jax.random.PRNGKey(0)
    keys = jax.random.split(key, 8)

    # Deterministic synthetic parameters (already in kernel layout:
    # conv weights are (tap, C_in, C_out); linear weight is (C_in, C_out)).
    embed_table = jax.random.normal(keys[0], (num_tokens, emsize), jnp.float32) * 0.1
    wr = jax.random.normal(keys[1], (3, emsize, kernel_num), jnp.float32) * 0.1  # Conv2d(1,C,(3,E))
    br = jax.random.normal(keys[2], (1, kernel_num), jnp.float32) * 0.1
    wc = jax.random.normal(keys[3], (3, kernel_num, kernel_num), jnp.float32) * 0.1  # Conv1d(C,C,3)
    bc = jax.random.normal(keys[4], (1, kernel_num), jnp.float32) * 0.1
    wl = jax.random.normal(keys[5], (kernel_num, n_classes), jnp.float32) * 0.1  # Linear(C, n_cls)
    bl = jax.random.normal(keys[6], (1, n_classes), jnp.float32) * 0.1

    tokens = jax.random.randint(keys[7], (seq_len, batch), 0, num_tokens, jnp.int32)
    params = (embed_table, wr, br, wc, bc, wl, bl)

    logits, feats = dpcnn_forward(tokens, params)
    jax.block_until_ready((logits, feats))

    assert logits.shape == (batch, n_classes), logits.shape
    assert feats.shape == (batch, kernel_num), feats.shape
    assert bool(jnp.all(jnp.isfinite(logits))) and bool(jnp.all(jnp.isfinite(feats)))

    # Numerical check against an independent pure-JAX reference of the
    # PyTorch forward (loose tol covers bf16 MXU operands / accumulation
    # order differences in the kernel).
    ref_logits, ref_feats = dpcnn_reference(tokens, params)
    assert bool(jnp.allclose(feats, ref_feats, rtol=2e-2, atol=2e-2)), (
        "feat max abs err", float(jnp.max(jnp.abs(feats - ref_feats))))
    assert bool(jnp.allclose(logits, ref_logits, rtol=2e-2, atol=2e-2)), (
        "logit max abs err", float(jnp.max(jnp.abs(logits - ref_logits))))

    print("KERNEL_OK")
</pallas_src>

<mosaic_0001>
module attributes {stable_mosaic.version = 11 : i64} {
  func.func @dpcnn_kernel(%arg0: i32, %arg1: memref<16xi32, #tpu.memory_space<smem>>, %arg2: memref<50x1x32xbf16, #tpu.memory_space<vmem>>, %arg3: memref<3x32x32xbf16, #tpu.memory_space<vmem>>, %arg4: memref<1x32xf32, #tpu.memory_space<vmem>>, %arg5: memref<3x32x32xbf16, #tpu.memory_space<vmem>>, %arg6: memref<1x32xf32, #tpu.memory_space<vmem>>, %arg7: memref<32x4xbf16, #tpu.memory_space<vmem>>, %arg8: memref<1x4xf32, #tpu.memory_space<vmem>>, %arg9: memref<1x1x4xf32, #tpu.memory_space<vmem>>, %arg10: memref<1x1x32xf32, #tpu.memory_space<vmem>>, %arg11: memref<1x8x32xf32, #tpu.memory_space<vmem>>, %arg12: memref<1x16x32xf32, #tpu.memory_space<vmem>>) attributes {dimension_semantics = [#tpu.dimension_semantics<parallel>], iteration_bounds = array<i64: 2>, scalar_prefetch = 1 : i64, scratch_operands = 2 : i64, tpu.core_type = #tpu.core_type<tc>, window_params = [{pipeline_mode = #tpu.pipeline_mode<synchronous>, transform_indices = @transform_0, window_bounds = array<i64: 50, 1, 32>}, {pipeline_mode = #tpu.pipeline_mode<synchronous>, transform_indices = @transform_1, window_bounds = array<i64: 3, 32, 32>}, {pipeline_mode = #tpu.pipeline_mode<synchronous>, transform_indices = @transform_2, window_bounds = array<i64: 1, 32>}, {pipeline_mode = #tpu.pipeline_mode<synchronous>, transform_indices = @transform_3, window_bounds = array<i64: 3, 32, 32>}, {pipeline_mode = #tpu.pipeline_mode<synchronous>, transform_indices = @transform_4, window_bounds = array<i64: 1, 32>}, {pipeline_mode = #tpu.pipeline_mode<synchronous>, transform_indices = @transform_5, window_bounds = array<i64: 32, 4>}, {pipeline_mode = #tpu.pipeline_mode<synchronous>, transform_indices = @transform_6, window_bounds = array<i64: 1, 4>}, {transform_indices = @transform_7, window_bounds = array<i64: 1, 1, 4>}, {transform_indices = @transform_8, window_bounds = array<i64: 1, 1, 32>}]} {
    %c8_i32 = arith.constant 8 : i32
    %0 = arith.muli %arg0, %c8_i32 : i32
    %c0_i32 = arith.constant 0 : i32
    %1 = arith.addi %0, %c0_i32 : i32
    %c0_i32_0 = arith.constant 0 : i32
    %2 = arith.addi %1, %c0_i32_0 : i32
    %3 = arith.index_cast %2 : i32 to index
    %4 = memref.load %arg1[%3] : memref<16xi32, #tpu.memory_space<smem>>
    %5 = arith.index_cast %4 : i32 to index
    %c0 = arith.constant 0 : index
    %c0_1 = arith.constant 0 : index
    %6 = vector.load %arg2[%5, %c0, %c0_1] : memref<50x1x32xbf16, #tpu.memory_space<vmem>>, vector<1x1x32xbf16>
    %7 = vector.shape_cast %6 : vector<1x1x32xbf16> to vector<1x32xbf16>
    %8 = arith.extf %7 : vector<1x32xbf16> to vector<1x32xf32>
    %9 = vector.shape_cast %8 : vector<1x32xf32> to vector<1x1x32xf32>
    %c0_2 = arith.constant 0 : index
    %c0_3 = arith.constant 0 : index
    %c0_4 = arith.constant 0 : index
    %10 = vector.load %arg11[%c0_2, %c0_3, %c0_4] : memref<1x8x32xf32, #tpu.memory_space<vmem>>, vector<1x1x32xf32>
    tpu.vector_store %arg11[%c0_2, %c0_3, %c0_4], %9 {strides = array<i32>} : memref<1x8x32xf32, #tpu.memory_space<vmem>>, vector<1x1x32xf32>,
    %c0_i32_5 = arith.constant 0 : i32
    %11 = arith.addi %0, %c0_i32_5 : i32
    %c1_i32 = arith.constant 1 : i32
    %12 = arith.addi %11, %c1_i32 : i32
    %13 = arith.index_cast %12 : i32 to index
    %14 = memref.load %arg1[%13] : memref<16xi32, #tpu.memory_space<smem>>
    %15 = arith.index_cast %14 : i32 to index
    %c0_6 = arith.constant 0 : index
    %c0_7 = arith.constant 0 : index
    %16 = vector.load %arg2[%15, %c0_6, %c0_7] : memref<50x1x32xbf16, #tpu.memory_space<vmem>>, vector<1x1x32xbf16>
    %17 = vector.shape_cast %16 : vector<1x1x32xbf16> to vector<1x32xbf16>
    %18 = arith.extf %17 : vector<1x32xbf16> to vector<1x32xf32>
    %19 = vector.shape_cast %18 : vector<1x32xf32> to vector<1x1x32xf32>
    %c0_8 = arith.constant 0 : index
    %c1 = arith.constant 1 : index
    %c0_9 = arith.constant 0 : index
    %20 = vector.load %arg11[%c0_8, %c1, %c0_9] : memref<1x8x32xf32, #tpu.memory_space<vmem>>, vector<1x1x32xf32>
    tpu.vector_store %arg11[%c0_8, %c1, %c0_9], %19 {strides = array<i32>} : memref<1x8x32xf32, #tpu.memory_space<vmem>>, vector<1x1x32xf32>,
    %c0_i32_10 = arith.constant 0 : i32
    %21 = arith.addi %0, %c0_i32_10 : i32
    %c2_i32 = arith.constant 2 : i32
    %22 = arith.addi %21, %c2_i32 : i32
    %23 = arith.index_cast %22 : i32 to index
    %24 = memref.load %arg1[%23] : memref<16xi32, #tpu.memory_space<smem>>
    %25 = arith.index_cast %24 : i32 to index
    %c0_11 = arith.constant 0 : index
    %c0_12 = arith.constant 0 : index
    %26 = vector.load %arg2[%25, %c0_11, %c0_12] : memref<50x1x32xbf16, #tpu.memory_space<vmem>>, vector<1x1x32xbf16>
    %27 = vector.shape_cast %26 : vector<1x1x32xbf16> to vector<1x32xbf16>
    %28 = arith.extf %27 : vector<1x32xbf16> to vector<1x32xf32>
    %29 = vector.shape_cast %28 : vector<1x32xf32> to vector<1x1x32xf32>
    %c0_13 = arith.constant 0 : index
    %c2 = arith.constant 2 : index
    %c0_14 = arith.constant 0 : index
    %30 = vector.load %arg11[%c0_13, %c2, %c0_14] : memref<1x8x32xf32, #tpu.memory_space<vmem>>, vector<1x1x32xf32>
    tpu.vector_store %arg11[%c0_13, %c2, %c0_14], %29 {strides = array<i32>} : memref<1x8x32xf32, #tpu.memory_space<vmem>>, vector<1x1x32xf32>,
    %c0_i32_15 = arith.constant 0 : i32
    %31 = arith.addi %0, %c0_i32_15 : i32
    %c3_i32 = arith.constant 3 : i32
    %32 = arith.addi %31, %c3_i32 : i32
    %33 = arith.index_cast %32 : i32 to index
    %34 = memref.load %arg1[%33] : memref<16xi32, #tpu.memory_space<smem>>
    %35 = arith.index_cast %34 : i32 to index
    %c0_16 = arith.constant 0 : index
    %c0_17 = arith.constant 0 : index
    %36 = vector.load %arg2[%35, %c0_16, %c0_17] : memref<50x1x32xbf16, #tpu.memory_space<vmem>>, vector<1x1x32xbf16>
    %37 = vector.shape_cast %36 : vector<1x1x32xbf16> to vector<1x32xbf16>
    %38 = arith.extf %37 : vector<1x32xbf16> to vector<1x32xf32>
    %39 = vector.shape_cast %38 : vector<1x32xf32> to vector<1x1x32xf32>
    %c0_18 = arith.constant 0 : index
    %c3 = arith.constant 3 : index
    %c0_19 = arith.constant 0 : index
    %40 = vector.load %arg11[%c0_18, %c3, %c0_19] : memref<1x8x32xf32, #tpu.memory_space<vmem>>, vector<1x1x32xf32>
    tpu.vector_store %arg11[%c0_18, %c3, %c0_19], %39 {strides = array<i32>} : memref<1x8x32xf32, #tpu.memory_space<vmem>>, vector<1x1x32xf32>,
    %c0_i32_20 = arith.constant 0 : i32
    %41 = arith.addi %0, %c0_i32_20 : i32
    %c4_i32 = arith.constant 4 : i32
    %42 = arith.addi %41, %c4_i32 : i32
    %43 = arith.index_cast %42 : i32 to index
    %44 = memref.load %arg1[%43] : memref<16xi32, #tpu.memory_space<smem>>
    %45 = arith.index_cast %44 : i32 to index
    %c0_21 = arith.constant 0 : index
    %c0_22 = arith.constant 0 : index
    %46 = vector.load %arg2[%45, %c0_21, %c0_22] : memref<50x1x32xbf16, #tpu.memory_space<vmem>>, vector<1x1x32xbf16>
    %47 = vector.shape_cast %46 : vector<1x1x32xbf16> to vector<1x32xbf16>
    %48 = arith.extf %47 : vector<1x32xbf16> to vector<1x32xf32>
    %49 = vector.shape_cast %48 : vector<1x32xf32> to vector<1x1x32xf32>
    %c0_23 = arith.constant 0 : index
    %c4 = arith.constant 4 : index
    %c0_24 = arith.constant 0 : index
    %50 = vector.load %arg11[%c0_23, %c4, %c0_24] : memref<1x8x32xf32, #tpu.memory_space<vmem>>, vector<1x1x32xf32>
    tpu.vector_store %arg11[%c0_23, %c4, %c0_24], %49 {strides = array<i32>} : memref<1x8x32xf32, #tpu.memory_space<vmem>>, vector<1x1x32xf32>,
    %c0_i32_25 = arith.constant 0 : i32
    %51 = arith.addi %0, %c0_i32_25 : i32
    %c5_i32 = arith.constant 5 : i32
    %52 = arith.addi %51, %c5_i32 : i32
    %53 = arith.index_cast %52 : i32 to index
    %54 = memref.load %arg1[%53] : memref<16xi32, #tpu.memory_space<smem>>
    %55 = arith.index_cast %54 : i32 to index
    %c0_26 = arith.constant 0 : index
    %c0_27 = arith.constant 0 : index
    %56 = vector.load %arg2[%55, %c0_26, %c0_27] : memref<50x1x32xbf16, #tpu.memory_space<vmem>>, vector<1x1x32xbf16>
    %57 = vector.shape_cast %56 : vector<1x1x32xbf16> to vector<1x32xbf16>
    %58 = arith.extf %57 : vector<1x32xbf16> to vector<1x32xf32>
    %59 = vector.shape_cast %58 : vector<1x32xf32> to vector<1x1x32xf32>
    %c0_28 = arith.constant 0 : index
    %c5 = arith.constant 5 : index
    %c0_29 = arith.constant 0 : index
    %60 = vector.load %arg11[%c0_28, %c5, %c0_29] : memref<1x8x32xf32, #tpu.memory_space<vmem>>, vector<1x1x32xf32>
    tpu.vector_store %arg11[%c0_28, %c5, %c0_29], %59 {strides = array<i32>} : memref<1x8x32xf32, #tpu.memory_space<vmem>>, vector<1x1x32xf32>,
    %c0_i32_30 = arith.constant 0 : i32
    %61 = arith.addi %0, %c0_i32_30 : i32
    %c6_i32 = arith.constant 6 : i32
    %62 = arith.addi %61, %c6_i32 : i32
    %63 = arith.index_cast %62 : i32 to index
    %64 = memref.load %arg1[%63] : memref<16xi32, #tpu.memory_space<smem>>
    %65 = arith.index_cast %64 : i32 to index
    %c0_31 = arith.constant 0 : index
    %c0_32 = arith.constant 0 : index
    %66 = vector.load %arg2[%65, %c0_31, %c0_32] : memref<50x1x32xbf16, #tpu.memory_space<vmem>>, vector<1x1x32xbf16>
    %67 = vector.shape_cast %66 : vector<1x1x32xbf16> to vector<1x32xbf16>
    %68 = arith.extf %67 : vector<1x32xbf16> to vector<1x32xf32>
    %69 = vector.shape_cast %68 : vector<1x32xf32> to vector<1x1x32xf32>
    %c0_33 = arith.constant 0 : index
    %c6 = arith.constant 6 : index
    %c0_34 = arith.constant 0 : index
    %70 = vector.load %arg11[%c0_33, %c6, %c0_34] : memref<1x8x32xf32, #tpu.memory_space<vmem>>, vector<1x1x32xf32>
    tpu.vector_store %arg11[%c0_33, %c6, %c0_34], %69 {strides = array<i32>} : memref<1x8x32xf32, #tpu.memory_space<vmem>>, vector<1x1x32xf32>,
    %c0_i32_35 = arith.constant 0 : i32
    %71 = arith.addi %0, %c0_i32_35 : i32
    %c7_i32 = arith.constant 7 : i32
    %72 = arith.addi %71, %c7_i32 : i32
    %73 = arith.index_cast %72 : i32 to index
    %74 = memref.load %arg1[%73] : memref<16xi32, #tpu.memory_space<smem>>
    %75 = arith.index_cast %74 : i32 to index
    %c0_36 = arith.constant 0 : index
    %c0_37 = arith.constant 0 : index
    %76 = vector.load %arg2[%75, %c0_36, %c0_37] : memref<50x1x32xbf16, #tpu.memory_space<vmem>>, vector<1x1x32xbf16>
    %77 = vector.shape_cast %76 : vector<1x1x32xbf16> to vector<1x32xbf16>
    %78 = arith.extf %77 : vector<1x32xbf16> to vector<1x32xf32>
    %79 = vector.shape_cast %78 : vector<1x32xf32> to vector<1x1x32xf32>
    %c0_38 = arith.constant 0 : index
    %c7 = arith.constant 7 : index
    %c0_39 = arith.constant 0 : index
    %80 = vector.load %arg11[%c0_38, %c7, %c0_39] : memref<1x8x32xf32, #tpu.memory_space<vmem>>, vector<1x1x32xf32>
    tpu.vector_store %arg11[%c0_38, %c7, %c0_39], %79 {strides = array<i32>} : memref<1x8x32xf32, #tpu.memory_space<vmem>>, vector<1x1x32xf32>,
    %cst = arith.constant 0.000000e+00 : f32
    %81 = vector.broadcast %cst : f32 to vector<1x1x32xf32>
    %c0_40 = arith.constant 0 : index
    %c7_41 = arith.constant 7 : index
    %c0_42 = arith.constant 0 : index
    %82 = vector.load %arg12[%c0_40, %c7_41, %c0_42] : memref<1x16x32xf32, #tpu.memory_space<vmem>>, vector<1x1x32xf32>
    tpu.vector_store %arg12[%c0_40, %c7_41, %c0_42], %81 {strides = array<i32>} : memref<1x16x32xf32, #tpu.memory_space<vmem>>, vector<1x1x32xf32>,
    %c0_43 = arith.constant 0 : index
    %c14 = arith.constant 14 : index
    %c0_44 = arith.constant 0 : index
    %83 = vector.load %arg12[%c0_43, %c14, %c0_44] : memref<1x16x32xf32, #tpu.memory_space<vmem>>, vector<1x1x32xf32>
    tpu.vector_store %arg12[%c0_43, %c14, %c0_44], %81 {strides = array<i32>} : memref<1x16x32xf32, #tpu.memory_space<vmem>>, vector<1x1x32xf32>,
    %c0_45 = arith.constant 0 : index
    %c0_46 = arith.constant 0 : index
    %84 = vector.load %arg4[%c0_45, %c0_46] : memref<1x32xf32, #tpu.memory_space<vmem>>, vector<1x32xf32>
    %c0_47 = arith.constant 0 : index
    %c0_48 = arith.constant 0 : index
    %85 = vector.load %arg6[%c0_47, %c0_48] : memref<1x32xf32, #tpu.memory_space<vmem>>, vector<1x32xf32>
    %c0_49 = arith.constant 0 : index
    %c0_50 = arith.constant 0 : index
    %c0_51 = arith.constant 0 : index
    %86 = vector.load %arg11[%c0_49, %c0_50, %c0_51] : memref<1x8x32xf32, #tpu.memory_space<vmem>>, vector<1x8x32xf32>
    %87 = vector.extract_strided_slice %86 {offsets = [0, 0, 0], sizes = [1, 6, 32], strides = [1, 1, 1]} : vector<1x8x32xf32> to vector<1x6x32xf32>
    %88 = vector.shape_cast %87 : vector<1x6x32xf32> to vector<6x32xf32>
    %89 = arith.truncf %88 : vector<6x32xf32> to vector<6x32xbf16>
    %c0_52 = arith.constant 0 : index
    %c0_53 = arith.constant 0 : index
    %c0_54 = arith.constant 0 : index
    %90 = vector.load %arg3[%c0_52, %c0_53, %c0_54] : memref<3x32x32xbf16, #tpu.memory_space<vmem>>, vector<1x32x32xbf16>
    %91 = vector.shape_cast %90 : vector<1x32x32xbf16> to vector<32x32xbf16>
    %cst_55 = arith.constant dense<0.000000e+00> : vector<6x32xf32>
    %92 = tpu.matmul %89, %91, %cst_55 {dimension_numbers = #tpu.dot_dimension_numbers<[1], [0], [0], [1], [0, 0, 1, 1], [], []>} : vector<6x32xbf16>, vector<32x32xbf16>, vector<6x32xf32> -> vector<6x32xf32>
    %93 = vector.extract_strided_slice %86 {offsets = [0, 1, 0], sizes = [1, 6, 32], strides = [1, 1, 1]} : vector<1x8x32xf32> to vector<1x6x32xf32>
    %94 = vector.shape_cast %93 : vector<1x6x32xf32> to vector<6x32xf32>
    %95 = arith.truncf %94 : vector<6x32xf32> to vector<6x32xbf16>
    %c1_56 = arith.constant 1 : index
    %c0_57 = arith.constant 0 : index
    %c0_58 = arith.constant 0 : index
    %96 = vector.load %arg3[%c1_56, %c0_57, %c0_58] : memref<3x32x32xbf16, #tpu.memory_space<vmem>>, vector<1x32x32xbf16>
    %97 = vector.shape_cast %96 : vector<1x32x32xbf16> to vector<32x32xbf16>
    %cst_59 = arith.constant dense<0.000000e+00> : vector<6x32xf32>
    %98 = tpu.matmul %95, %97, %cst_59 {dimension_numbers = #tpu.dot_dimension_numbers<[1], [0], [0], [1], [0, 0, 1, 1], [], []>} : vector<6x32xbf16>, vector<32x32xbf16>, vector<6x32xf32> -> vector<6x32xf32>
    %99 = arith.addf %92, %98 : vector<6x32xf32>
    %100 = vector.extract_strided_slice %86 {offsets = [0, 2, 0], sizes = [1, 6, 32], strides = [1, 1, 1]} : vector<1x8x32xf32> to vector<1x6x32xf32>
    %101 = vector.shape_cast %100 : vector<1x6x32xf32> to vector<6x32xf32>
    %102 = arith.truncf %101 : vector<6x32xf32> to vector<6x32xbf16>
    %c2_60 = arith.constant 2 : index
    %c0_61 = arith.constant 0 : index
    %c0_62 = arith.constant 0 : index
    %103 = vector.load %arg3[%c2_60, %c0_61, %c0_62] : memref<3x32x32xbf16, #tpu.memory_space<vmem>>, vector<1x32x32xbf16>
    %104 = vector.shape_cast %103 : vector<1x32x32xbf16> to vector<32x32xbf16>
    %cst_63 = arith.constant dense<0.000000e+00> : vector<6x32xf32>
    %105 = tpu.matmul %102, %104, %cst_63 {dimension_numbers = #tpu.dot_dimension_numbers<[1], [0], [0], [1], [0, 0, 1, 1], [], []>} : vector<6x32xbf16>, vector<32x32xbf16>, vector<6x32xf32> -> vector<6x32xf32>
    %106 = arith.addf %99, %105 : vector<6x32xf32>
    %107 = vector.broadcast %84 : vector<1x32xf32> to vector<6x32xf32>
    %108 = arith.addf %106, %107 : vector<6x32xf32>
    %109 = vector.shape_cast %108 : vector<6x32xf32> to vector<1x6x32xf32>
    %c0_64 = arith.constant 0 : index
    %c8 = arith.constant 8 : index
    %c0_65 = arith.constant 0 : index
    %110 = vector.load %arg12[%c0_64, %c8, %c0_65] : memref<1x16x32xf32, #tpu.memory_space<vmem>>, vector<1x6x32xf32>
    tpu.vector_store %arg12[%c0_64, %c8, %c0_65], %109 {strides = array<i32>} : memref<1x16x32xf32, #tpu.memory_space<vmem>>, vector<1x6x32xf32>,
    %c0_66 = arith.constant 0 : index
    %c7_67 = arith.constant 7 : index
    %c0_68 = arith.constant 0 : index
    %111 = vector.load %arg12[%c0_66, %c7_67, %c0_68] : memref<1x16x32xf32, #tpu.memory_space<vmem>>, vector<1x8x32xf32>
    %cst_69 = arith.constant 0.000000e+00 : f32
    %112 = vector.broadcast %cst_69 : f32 to vector<1x8x32xf32>
    %113 = arith.maximumf %111, %112 : vector<1x8x32xf32>
    %114 = vector.extract_strided_slice %113 {offsets = [0, 0, 0], sizes = [1, 6, 32], strides = [1, 1, 1]} : vector<1x8x32xf32> to vector<1x6x32xf32>
    %115 = vector.shape_cast %114 : vector<1x6x32xf32> to vector<6x32xf32>
    %116 = arith.truncf %115 : vector<6x32xf32> to vector<6x32xbf16>
    %c0_70 = arith.constant 0 : index
    %c0_71 = arith.constant 0 : index
    %c0_72 = arith.constant 0 : index
    %117 = vector.load %arg5[%c0_70, %c0_71, %c0_72] : memref<3x32x32xbf16, #tpu.memory_space<vmem>>, vector<1x32x32xbf16>
    %118 = vector.shape_cast %117 : vector<1x32x32xbf16> to vector<32x32xbf16>
    %cst_73 = arith.constant dense<0.000000e+00> : vector<6x32xf32>
    %119 = tpu.matmul %116, %118, %cst_73 {dimension_numbers = #tpu.dot_dimension_numbers<[1], [0], [0], [1], [0, 0, 1, 1], [], []>} : vector<6x32xbf16>, vector<32x32xbf16>, vector<6x32xf32> -> vector<6x32xf32>
    %120 = vector.extract_strided_slice %113 {offsets = [0, 1, 0], sizes = [1, 6, 32], strides = [1, 1, 1]} : vector<1x8x32xf32> to vector<1x6x32xf32>
    %121 = vector.shape_cast %120 : vector<1x6x32xf32> to vector<6x32xf32>
    %122 = arith.truncf %121 : vector<6x32xf32> to vector<6x32xbf16>
    %c1_74 = arith.constant 1 : index
    %c0_75 = arith.constant 0 : index
    %c0_76 = arith.constant 0 : index
    %123 = vector.load %arg5[%c1_74, %c0_75, %c0_76] : memref<3x32x32xbf16, #tpu.memory_space<vmem>>, vector<1x32x32xbf16>
    %124 = vector.shape_cast %123 : vector<1x32x32xbf16> to vector<32x32xbf16>
    %cst_77 = arith.constant dense<0.000000e+00> : vector<6x32xf32>
    %125 = tpu.matmul %122, %124, %cst_77 {dimension_numbers = #tpu.dot_dimension_numbers<[1], [0], [0], [1], [0, 0, 1, 1], [], []>} : vector<6x32xbf16>, vector<32x32xbf16>, vector<6x32xf32> -> vector<6x32xf32>
    %126 = arith.addf %119, %125 : vector<6x32xf32>
    %127 = vector.extract_strided_slice %113 {offsets = [0, 2, 0], sizes = [1, 6, 32], strides = [1, 1, 1]} : vector<1x8x32xf32> to vector<1x6x32xf32>
    %128 = vector.shape_cast %127 : vector<1x6x32xf32> to vector<6x32xf32>
    %129 = arith.truncf %128 : vector<6x32xf32> to vector<6x32xbf16>
    %c2_78 = arith.constant 2 : index
    %c0_79 = arith.constant 0 : index
    %c0_80 = arith.constant 0 : index
    %130 = vector.load %arg5[%c2_78, %c0_79, %c0_80] : memref<3x32x32xbf16, #tpu.memory_space<vmem>>, vector<1x32x32xbf16>
    %131 = vector.shape_cast %130 : vector<1x32x32xbf16> to vector<32x32xbf16>
    %cst_81 = arith.constant dense<0.000000e+00> : vector<6x32xf32>
    %132 = tpu.matmul %129, %131, %cst_81 {dimension_numbers = #tpu.dot_dimension_numbers<[1], [0], [0], [1], [0, 0, 1, 1], [], []>} : vector<6x32xbf16>, vector<32x32xbf16>, vector<6x32xf32> -> vector<6x32xf32>
    %133 = arith.addf %126, %132 : vector<6x32xf32>
    %134 = vector.broadcast %85 : vector<1x32xf32> to vector<6x32xf32>
    %135 = arith.addf %133, %134 : vector<6x32xf32>
    %136 = vector.shape_cast %135 : vector<6x32xf32> to vector<1x6x32xf32>
    %c0_82 = arith.constant 0 : index
    %c8_83 = arith.constant 8 : index
    %c0_84 = arith.constant 0 : index
    %137 = vector.load %arg12[%c0_82, %c8_83, %c0_84] : memref<1x16x32xf32, #tpu.memory_space<vmem>>, vector<1x6x32xf32>
    tpu.vector_store %arg12[%c0_82, %c8_83, %c0_84], %136 {strides = array<i32>} : memref<1x16x32xf32, #tpu.memory_space<vmem>>, vector<1x6x32xf32>,
    %c0_85 = arith.constant 0 : index
    %c7_86 = arith.constant 7 : index
    %c0_87 = arith.constant 0 : index
    %138 = vector.load %arg12[%c0_85, %c7_86, %c0_87] : memref<1x16x32xf32, #tpu.memory_space<vmem>>, vector<1x8x32xf32>
    %cst_88 = arith.constant 0.000000e+00 : f32
    %139 = vector.broadcast %cst_88 : f32 to vector<1x8x32xf32>
    %140 = arith.maximumf %138, %139 : vector<1x8x32xf32>
    %141 = vector.extract_strided_slice %140 {offsets = [0, 0, 0], sizes = [1, 6, 32], strides = [1, 1, 1]} : vector<1x8x32xf32> to vector<1x6x32xf32>
    %142 = vector.shape_cast %141 : vector<1x6x32xf32> to vector<6x32xf32>
    %143 = arith.truncf %142 : vector<6x32xf32> to vector<6x32xbf16>
    %c0_89 = arith.constant 0 : index
    %c0_90 = arith.constant 0 : index
    %c0_91 = arith.constant 0 : index
    %144 = vector.load %arg5[%c0_89, %c0_90, %c0_91] : memref<3x32x32xbf16, #tpu.memory_space<vmem>>, vector<1x32x32xbf16>
    %145 = vector.shape_cast %144 : vector<1x32x32xbf16> to vector<32x32xbf16>
    %cst_92 = arith.constant dense<0.000000e+00> : vector<6x32xf32>
    %146 = tpu.matmul %143, %145, %cst_92 {dimension_numbers = #tpu.dot_dimension_numbers<[1], [0], [0], [1], [0, 0, 1, 1], [], []>} : vector<6x32xbf16>, vector<32x32xbf16>, vector<6x32xf32> -> vector<6x32xf32>
    %147 = vector.extract_strided_slice %140 {offsets = [0, 1, 0], sizes = [1, 6, 32], strides = [1, 1, 1]} : vector<1x8x32xf32> to vector<1x6x32xf32>
    %148 = vector.shape_cast %147 : vector<1x6x32xf32> to vector<6x32xf32>
    %149 = arith.truncf %148 : vector<6x32xf32> to vector<6x32xbf16>
    %c1_93 = arith.constant 1 : index
    %c0_94 = arith.constant 0 : index
    %c0_95 = arith.constant 0 : index
    %150 = vector.load %arg5[%c1_93, %c0_94, %c0_95] : memref<3x32x32xbf16, #tpu.memory_space<vmem>>, vector<1x32x32xbf16>
    %151 = vector.shape_cast %150 : vector<1x32x32xbf16> to vector<32x32xbf16>
    %cst_96 = arith.constant dense<0.000000e+00> : vector<6x32xf32>
    %152 = tpu.matmul %149, %151, %cst_96 {dimension_numbers = #tpu.dot_dimension_numbers<[1], [0], [0], [1], [0, 0, 1, 1], [], []>} : vector<6x32xbf16>, vector<32x32xbf16>, vector<6x32xf32> -> vector<6x32xf32>
    %153 = arith.addf %146, %152 : vector<6x32xf32>
    %154 = vector.extract_strided_slice %140 {offsets = [0, 2, 0], sizes = [1, 6, 32], strides = [1, 1, 1]} : vector<1x8x32xf32> to vector<1x6x32xf32>
    %155 = vector.shape_cast %154 : vector<1x6x32xf32> to vector<6x32xf32>
    %156 = arith.truncf %155 : vector<6x32xf32> to vector<6x32xbf16>
    %c2_97 = arith.constant 2 : index
    %c0_98 = arith.constant 0 : index
    %c0_99 = arith.constant 0 : index
    %157 = vector.load %arg5[%c2_97, %c0_98, %c0_99] : memref<3x32x32xbf16, #tpu.memory_space<vmem>>, vector<1x32x32xbf16>
    %158 = vector.shape_cast %157 : vector<1x32x32xbf16> to vector<32x32xbf16>
    %cst_100 = arith.constant dense<0.000000e+00> : vector<6x32xf32>
    %159 = tpu.matmul %156, %158, %cst_100 {dimension_numbers = #tpu.dot_dimension_numbers<[1], [0], [0], [1], [0, 0, 1, 1], [], []>} : vector<6x32xbf16>, vector<32x32xbf16>, vector<6x32xf32> -> vector<6x32xf32>
    %160 = arith.addf %153, %159 : vector<6x32xf32>
    %161 = vector.broadcast %85 : vector<1x32xf32> to vector<6x32xf32>
    %162 = arith.addf %160, %161 : vector<6x32xf32>
    %163 = vector.shape_cast %162 : vector<6x32xf32> to vector<1x6x32xf32>
    %c0_101 = arith.constant 0 : index
    %c8_102 = arith.constant 8 : index
    %c0_103 = arith.constant 0 : index
    %164 = vector.load %arg12[%c0_101, %c8_102, %c0_103] : memref<1x16x32xf32, #tpu.memory_space<vmem>>, vector<1x6x32xf32>
    tpu.vector_store %arg12[%c0_101, %c8_102, %c0_103], %163 {strides = array<i32>} : memref<1x16x32xf32, #tpu.memory_space<vmem>>, vector<1x6x32xf32>,
    %c0_104 = arith.constant 0 : index
    %c7_105 = arith.constant 7 : index
    %c0_106 = arith.constant 0 : index
    %165 = tpu.strided_load %arg12[%c0_104, %c7_105, %c0_106] {strides = array<i32: 1, 2, 1>} : memref<1x16x32xf32, #tpu.memory_space<vmem>>, vector<1x3x32xf32>
    %c0_107 = arith.constant 0 : index
    %c8_108 = arith.constant 8 : index
    %c0_109 = arith.constant 0 : index
    %166 = tpu.strided_load %arg12[%c0_107, %c8_108, %c0_109] {strides = array<i32: 1, 2, 1>} : memref<1x16x32xf32, #tpu.memory_space<vmem>>, vector<1x3x32xf32>
    %c0_110 = arith.constant 0 : index
    %c9 = arith.constant 9 : index
    %c0_111 = arith.constant 0 : index
    %167 = tpu.strided_load %arg12[%c0_110, %c9, %c0_111] {strides = array<i32: 1, 2, 1>} : memref<1x16x32xf32, #tpu.memory_space<vmem>>, vector<1x3x32xf32>
    %168 = arith.maximumf %165, %166 : vector<1x3x32xf32>
    %169 = arith.maximumf %168, %167 : vector<1x3x32xf32>
    %c0_112 = arith.constant 0 : index
    %c8_113 = arith.constant 8 : index
    %c0_114 = arith.constant 0 : index
    %170 = vector.load %arg12[%c0_112, %c8_113, %c0_114] : memref<1x16x32xf32, #tpu.memory_space<vmem>>, vector<1x3x32xf32>
    tpu.vector_store %arg12[%c0_112, %c8_113, %c0_114], %169 {strides = array<i32>} : memref<1x16x32xf32, #tpu.memory_space<vmem>>, vector<1x3x32xf32>,
    %c0_115 = arith.constant 0 : index
    %c11 = arith.constant 11 : index
    %c0_116 = arith.constant 0 : index
    %171 = vector.load %arg12[%c0_115, %c11, %c0_116] : memref<1x16x32xf32, #tpu.memory_space<vmem>>, vector<1x1x32xf32>
    tpu.vector_store %arg12[%c0_115, %c11, %c0_116], %81 {strides = array<i32>} : memref<1x16x32xf32, #tpu.memory_space<vmem>>, vector<1x1x32xf32>,
    %c0_117 = arith.constant 0 : index
    %c7_118 = arith.constant 7 : index
    %c0_119 = arith.constant 0 : index
    %172 = vector.load %arg12[%c0_117, %c7_118, %c0_119] : memref<1x16x32xf32, #tpu.memory_space<vmem>>, vector<1x5x32xf32>
    %cst_120 = arith.constant 0.000000e+00 : f32
    %173 = vector.broadcast %cst_120 : f32 to vector<1x5x32xf32>
    %174 = arith.maximumf %172, %173 : vector<1x5x32xf32>
    %175 = vector.extract_strided_slice %174 {offsets = [0, 0, 0], sizes = [1, 3, 32], strides = [1, 1, 1]} : vector<1x5x32xf32> to vector<1x3x32xf32>
    %176 = vector.shape_cast %175 : vector<1x3x32xf32> to vector<3x32xf32>
    %177 = arith.truncf %176 : vector<3x32xf32> to vector<3x32xbf16>
    %c0_121 = arith.constant 0 : index
    %c0_122 = arith.constant 0 : index
    %c0_123 = arith.constant 0 : index
    %178 = vector.load %arg5[%c0_121, %c0_122, %c0_123] : memref<3x32x32xbf16, #tpu.memory_space<vmem>>, vector<1x32x32xbf16>
    %179 = vector.shape_cast %178 : vector<1x32x32xbf16> to vector<32x32xbf16>
    %cst_124 = arith.constant dense<0.000000e+00> : vector<3x32xf32>
    %180 = tpu.matmul %177, %179, %cst_124 {dimension_numbers = #tpu.dot_dimension_numbers<[1], [0], [0], [1], [0, 0, 1, 1], [], []>} : vector<3x32xbf16>, vector<32x32xbf16>, vector<3x32xf32> -> vector<3x32xf32>
    %181 = vector.extract_strided_slice %174 {offsets = [0, 1, 0], sizes = [1, 3, 32], strides = [1, 1, 1]} : vector<1x5x32xf32> to vector<1x3x32xf32>
    %182 = vector.shape_cast %181 : vector<1x3x32xf32> to vector<3x32xf32>
    %183 = arith.truncf %182 : vector<3x32xf32> to vector<3x32xbf16>
    %c1_125 = arith.constant 1 : index
    %c0_126 = arith.constant 0 : index
    %c0_127 = arith.constant 0 : index
    %184 = vector.load %arg5[%c1_125, %c0_126, %c0_127] : memref<3x32x32xbf16, #tpu.memory_space<vmem>>, vector<1x32x32xbf16>
    %185 = vector.shape_cast %184 : vector<1x32x32xbf16> to vector<32x32xbf16>
    %cst_128 = arith.constant dense<0.000000e+00> : vector<3x32xf32>
    %186 = tpu.matmul %183, %185, %cst_128 {dimension_numbers = #tpu.dot_dimension_numbers<[1], [0], [0], [1], [0, 0, 1, 1], [], []>} : vector<3x32xbf16>, vector<32x32xbf16>, vector<3x32xf32> -> vector<3x32xf32>
    %187 = arith.addf %180, %186 : vector<3x32xf32>
    %188 = vector.extract_strided_slice %174 {offsets = [0, 2, 0], sizes = [1, 3, 32], strides = [1, 1, 1]} : vector<1x5x32xf32> to vector<1x3x32xf32>
    %189 = vector.shape_cast %188 : vector<1x3x32xf32> to vector<3x32xf32>
    %190 = arith.truncf %189 : vector<3x32xf32> to vector<3x32xbf16>
    %c2_129 = arith.constant 2 : index
    %c0_130 = arith.constant 0 : index
    %c0_131 = arith.constant 0 : index
    %191 = vector.load %arg5[%c2_129, %c0_130, %c0_131] : memref<3x32x32xbf16, #tpu.memory_space<vmem>>, vector<1x32x32xbf16>
    %192 = vector.shape_cast %191 : vector<1x32x32xbf16> to vector<32x32xbf16>
    %cst_132 = arith.constant dense<0.000000e+00> : vector<3x32xf32>
    %193 = tpu.matmul %190, %192, %cst_132 {dimension_numbers = #tpu.dot_dimension_numbers<[1], [0], [0], [1], [0, 0, 1, 1], [], []>} : vector<3x32xbf16>, vector<32x32xbf16>, vector<3x32xf32> -> vector<3x32xf32>
    %194 = arith.addf %187, %193 : vector<3x32xf32>
    %195 = vector.broadcast %85 : vector<1x32xf32> to vector<3x32xf32>
    %196 = arith.addf %194, %195 : vector<3x32xf32>
    %197 = vector.shape_cast %196 : vector<3x32xf32> to vector<1x3x32xf32>
    %c0_133 = arith.constant 0 : index
    %c8_134 = arith.constant 8 : index
    %c0_135 = arith.constant 0 : index
    %198 = vector.load %arg12[%c0_133, %c8_134, %c0_135] : memref<1x16x32xf32, #tpu.memory_space<vmem>>, vector<1x3x32xf32>
    tpu.vector_store %arg12[%c0_133, %c8_134, %c0_135], %197 {strides = array<i32>} : memref<1x16x32xf32, #tpu.memory_space<vmem>>, vector<1x3x32xf32>,
    %c0_136 = arith.constant 0 : index
    %c7_137 = arith.constant 7 : index
    %c0_138 = arith.constant 0 : index
    %199 = vector.load %arg12[%c0_136, %c7_137, %c0_138] : memref<1x16x32xf32, #tpu.memory_space<vmem>>, vector<1x5x32xf32>
    %cst_139 = arith.constant 0.000000e+00 : f32
    %200 = vector.broadcast %cst_139 : f32 to vector<1x5x32xf32>
    %201 = arith.maximumf %199, %200 : vector<1x5x32xf32>
    %202 = vector.extract_strided_slice %201 {offsets = [0, 0, 0], sizes = [1, 3, 32], strides = [1, 1, 1]} : vector<1x5x32xf32> to vector<1x3x32xf32>
    %203 = vector.shape_cast %202 : vector<1x3x32xf32> to vector<3x32xf32>
    %204 = arith.truncf %203 : vector<3x32xf32> to vector<3x32xbf16>
    %c0_140 = arith.constant 0 : index
    %c0_141 = arith.constant 0 : index
    %c0_142 = arith.constant 0 : index
    %205 = vector.load %arg5[%c0_140, %c0_141, %c0_142] : memref<3x32x32xbf16, #tpu.memory_space<vmem>>, vector<1x32x32xbf16>
    %206 = vector.shape_cast %205 : vector<1x32x32xbf16> to vector<32x32xbf16>
    %cst_143 = arith.constant dense<0.000000e+00> : vector<3x32xf32>
    %207 = tpu.matmul %204, %206, %cst_143 {dimension_numbers = #tpu.dot_dimension_numbers<[1], [0], [0], [1], [0, 0, 1, 1], [], []>} : vector<3x32xbf16>, vector<32x32xbf16>, vector<3x32xf32> -> vector<3x32xf32>
    %208 = vector.extract_strided_slice %201 {offsets = [0, 1, 0], sizes = [1, 3, 32], strides = [1, 1, 1]} : vector<1x5x32xf32> to vector<1x3x32xf32>
    %209 = vector.shape_cast %208 : vector<1x3x32xf32> to vector<3x32xf32>
    %210 = arith.truncf %209 : vector<3x32xf32> to vector<3x32xbf16>
    %c1_144 = arith.constant 1 : index
    %c0_145 = arith.constant 0 : index
    %c0_146 = arith.constant 0 : index
    %211 = vector.load %arg5[%c1_144, %c0_145, %c0_146] : memref<3x32x32xbf16, #tpu.memory_space<vmem>>, vector<1x32x32xbf16>
    %212 = vector.shape_cast %211 : vector<1x32x32xbf16> to vector<32x32xbf16>
    %cst_147 = arith.constant dense<0.000000e+00> : vector<3x32xf32>
    %213 = tpu.matmul %210, %212, %cst_147 {dimension_numbers = #tpu.dot_dimension_numbers<[1], [0], [0], [1], [0, 0, 1, 1], [], []>} : vector<3x32xbf16>, vector<32x32xbf16>, vector<3x32xf32> -> vector<3x32xf32>
    %214 = arith.addf %207, %213 : vector<3x32xf32>
    %215 = vector.extract_strided_slice %201 {offsets = [0, 2, 0], sizes = [1, 3, 32], strides = [1, 1, 1]} : vector<1x5x32xf32> to vector<1x3x32xf32>
    %216 = vector.shape_cast %215 : vector<1x3x32xf32> to vector<3x32xf32>
    %217 = arith.truncf %216 : vector<3x32xf32> to vector<3x32xbf16>
    %c2_148 = arith.constant 2 : index
    %c0_149 = arith.constant 0 : index
    %c0_150 = arith.constant 0 : index
    %218 = vector.load %arg5[%c2_148, %c0_149, %c0_150] : memref<3x32x32xbf16, #tpu.memory_space<vmem>>, vector<1x32x32xbf16>
    %219 = vector.shape_cast %218 : vector<1x32x32xbf16> to vector<32x32xbf16>
    %cst_151 = arith.constant dense<0.000000e+00> : vector<3x32xf32>
    %220 = tpu.matmul %217, %219, %cst_151 {dimension_numbers = #tpu.dot_dimension_numbers<[1], [0], [0], [1], [0, 0, 1, 1], [], []>} : vector<3x32xbf16>, vector<32x32xbf16>, vector<3x32xf32> -> vector<3x32xf32>
    %221 = arith.addf %214, %220 : vector<3x32xf32>
    %222 = vector.broadcast %85 : vector<1x32xf32> to vector<3x32xf32>
    %223 = arith.addf %221, %222 : vector<3x32xf32>
    %224 = vector.shape_cast %223 : vector<3x32xf32> to vector<1x3x32xf32>
    %225 = arith.addf %224, %169 : vector<1x3x32xf32>
    %c0_152 = arith.constant 0 : index
    %c8_153 = arith.constant 8 : index
    %c0_154 = arith.constant 0 : index
    %226 = vector.load %arg12[%c0_152, %c8_153, %c0_154] : memref<1x16x32xf32, #tpu.memory_space<vmem>>, vector<1x3x32xf32>
    tpu.vector_store %arg12[%c0_152, %c8_153, %c0_154], %225 {strides = array<i32>} : memref<1x16x32xf32, #tpu.memory_space<vmem>>, vector<1x3x32xf32>,
    %c0_155 = arith.constant 0 : index
    %c7_156 = arith.constant 7 : index
    %c0_157 = arith.constant 0 : index
    %227 = tpu.strided_load %arg12[%c0_155, %c7_156, %c0_157] {strides = array<i32: 1, 2, 1>} : memref<1x16x32xf32, #tpu.memory_space<vmem>>, vector<1x1x32xf32>
    %c0_158 = arith.constant 0 : index
    %c8_159 = arith.constant 8 : index
    %c0_160 = arith.constant 0 : index
    %228 = tpu.strided_load %arg12[%c0_158, %c8_159, %c0_160] {strides = array<i32: 1, 2, 1>} : memref<1x16x32xf32, #tpu.memory_space<vmem>>, vector<1x1x32xf32>
    %c0_161 = arith.constant 0 : index
    %c9_162 = arith.constant 9 : index
    %c0_163 = arith.constant 0 : index
    %229 = tpu.strided_load %arg12[%c0_161, %c9_162, %c0_163] {strides = array<i32: 1, 2, 1>} : memref<1x16x32xf32, #tpu.memory_space<vmem>>, vector<1x1x32xf32>
    %230 = arith.maximumf %227, %228 : vector<1x1x32xf32>
    %231 = arith.maximumf %230, %229 : vector<1x1x32xf32>
    %c0_164 = arith.constant 0 : index
    %c8_165 = arith.constant 8 : index
    %c0_166 = arith.constant 0 : index
    %232 = vector.load %arg12[%c0_164, %c8_165, %c0_166] : memref<1x16x32xf32, #tpu.memory_space<vmem>>, vector<1x1x32xf32>
    tpu.vector_store %arg12[%c0_164, %c8_165, %c0_166], %231 {strides = array<i32>} : memref<1x16x32xf32, #tpu.memory_space<vmem>>, vector<1x1x32xf32>,
    %c0_167 = arith.constant 0 : index
    %c9_168 = arith.constant 9 : index
    %c0_169 = arith.constant 0 : index
    %233 = vector.load %arg12[%c0_167, %c9_168, %c0_169] : memref<1x16x32xf32, #tpu.memory_space<vmem>>, vector<1x1x32xf32>
    tpu.vector_store %arg12[%c0_167, %c9_168, %c0_169], %81 {strides = array<i32>} : memref<1x16x32xf32, #tpu.memory_space<vmem>>, vector<1x1x32xf32>,
    %c0_170 = arith.constant 0 : index
    %c7_171 = arith.constant 7 : index
    %c0_172 = arith.constant 0 : index
    %234 = vector.load %arg12[%c0_170, %c7_171, %c0_172] : memref<1x16x32xf32, #tpu.memory_space<vmem>>, vector<1x3x32xf32>
    %cst_173 = arith.constant 0.000000e+00 : f32
    %235 = vector.broadcast %cst_173 : f32 to vector<1x3x32xf32>
    %236 = arith.maximumf %234, %235 : vector<1x3x32xf32>
    %237 = vector.extract_strided_slice %236 {offsets = [0, 0, 0], sizes = [1, 1, 32], strides = [1, 1, 1]} : vector<1x3x32xf32> to vector<1x1x32xf32>
    %238 = vector.shape_cast %237 : vector<1x1x32xf32> to vector<1x32xf32>
    %239 = arith.truncf %238 : vector<1x32xf32> to vector<1x32xbf16>
    %c0_174 = arith.constant 0 : index
    %c0_175 = arith.constant 0 : index
    %c0_176 = arith.constant 0 : index
    %240 = vector.load %arg5[%c0_174, %c0_175, %c0_176] : memref<3x32x32xbf16, #tpu.memory_space<vmem>>, vector<1x32x32xbf16>
    %241 = vector.shape_cast %240 : vector<1x32x32xbf16> to vector<32x32xbf16>
    %cst_177 = arith.constant dense<0.000000e+00> : vector<1x32xf32>
    %242 = tpu.matmul %239, %241, %cst_177 {dimension_numbers = #tpu.dot_dimension_numbers<[1], [0], [0], [1], [0, 0, 1, 1], [], []>} : vector<1x32xbf16>, vector<32x32xbf16>, vector<1x32xf32> -> vector<1x32xf32>
    %243 = vector.extract_strided_slice %236 {offsets = [0, 1, 0], sizes = [1, 1, 32], strides = [1, 1, 1]} : vector<1x3x32xf32> to vector<1x1x32xf32>
    %244 = vector.shape_cast %243 : vector<1x1x32xf32> to vector<1x32xf32>
    %245 = arith.truncf %244 : vector<1x32xf32> to vector<1x32xbf16>
    %c1_178 = arith.constant 1 : index
    %c0_179 = arith.constant 0 : index
    %c0_180 = arith.constant 0 : index
    %246 = vector.load %arg5[%c1_178, %c0_179, %c0_180] : memref<3x32x32xbf16, #tpu.memory_space<vmem>>, vector<1x32x32xbf16>
    %247 = vector.shape_cast %246 : vector<1x32x32xbf16> to vector<32x32xbf16>
    %cst_181 = arith.constant dense<0.000000e+00> : vector<1x32xf32>
    %248 = tpu.matmul %245, %247, %cst_181 {dimension_numbers = #tpu.dot_dimension_numbers<[1], [0], [0], [1], [0, 0, 1, 1], [], []>} : vector<1x32xbf16>, vector<32x32xbf16>, vector<1x32xf32> -> vector<1x32xf32>
    %249 = arith.addf %242, %248 : vector<1x32xf32>
    %250 = vector.extract_strided_slice %236 {offsets = [0, 2, 0], sizes = [1, 1, 32], strides = [1, 1, 1]} : vector<1x3x32xf32> to vector<1x1x32xf32>
    %251 = vector.shape_cast %250 : vector<1x1x32xf32> to vector<1x32xf32>
    %252 = arith.truncf %251 : vector<1x32xf32> to vector<1x32xbf16>
    %c2_182 = arith.constant 2 : index
    %c0_183 = arith.constant 0 : index
    %c0_184 = arith.constant 0 : index
    %253 = vector.load %arg5[%c2_182, %c0_183, %c0_184] : memref<3x32x32xbf16, #tpu.memory_space<vmem>>, vector<1x32x32xbf16>
    %254 = vector.shape_cast %253 : vector<1x32x32xbf16> to vector<32x32xbf16>
    %cst_185 = arith.constant dense<0.000000e+00> : vector<1x32xf32>
    %255 = tpu.matmul %252, %254, %cst_185 {dimension_numbers = #tpu.dot_dimension_numbers<[1], [0], [0], [1], [0, 0, 1, 1], [], []>} : vector<1x32xbf16>, vector<32x32xbf16>, vector<1x32xf32> -> vector<1x32xf32>
    %256 = arith.addf %249, %255 : vector<1x32xf32>
    %257 = arith.addf %256, %85 : vector<1x32xf32>
    %258 = vector.shape_cast %257 : vector<1x32xf32> to vector<1x1x32xf32>
    %c0_186 = arith.constant 0 : index
    %c8_187 = arith.constant 8 : index
    %c0_188 = arith.constant 0 : index
    %259 = vector.load %arg12[%c0_186, %c8_187, %c0_188] : memref<1x16x32xf32, #tpu.memory_space<vmem>>, vector<1x1x32xf32>
    tpu.vector_store %arg12[%c0_186, %c8_187, %c0_188], %258 {strides = array<i32>} : memref<1x16x32xf32, #tpu.memory_space<vmem>>, vector<1x1x32xf32>,
    %c0_189 = arith.constant 0 : index
    %c7_190 = arith.constant 7 : index
    %c0_191 = arith.constant 0 : index
    %260 = vector.load %arg12[%c0_189, %c7_190, %c0_191] : memref<1x16x32xf32, #tpu.memory_space<vmem>>, vector<1x3x32xf32>
    %cst_192 = arith.constant 0.000000e+00 : f32
    %261 = vector.broadcast %cst_192 : f32 to vector<1x3x32xf32>
    %262 = arith.maximumf %260, %261 : vector<1x3x32xf32>
    %263 = vector.extract_strided_slice %262 {offsets = [0, 0, 0], sizes = [1, 1, 32], strides = [1, 1, 1]} : vector<1x3x32xf32> to vector<1x1x32xf32>
    %264 = vector.shape_cast %263 : vector<1x1x32xf32> to vector<1x32xf32>
    %265 = arith.truncf %264 : vector<1x32xf32> to vector<1x32xbf16>
    %c0_193 = arith.constant 0 : index
    %c0_194 = arith.constant 0 : index
    %c0_195 = arith.constant 0 : index
    %266 = vector.load %arg5[%c0_193, %c0_194, %c0_195] : memref<3x32x32xbf16, #tpu.memory_space<vmem>>, vector<1x32x32xbf16>
    %267 = vector.shape_cast %266 : vector<1x32x32xbf16> to vector<32x32xbf16>
    %cst_196 = arith.constant dense<0.000000e+00> : vector<1x32xf32>
    %268 = tpu.matmul %265, %267, %cst_196 {dimension_numbers = #tpu.dot_dimension_numbers<[1], [0], [0], [1], [0, 0, 1, 1], [], []>} : vector<1x32xbf16>, vector<32x32xbf16>, vector<1x32xf32> -> vector<1x32xf32>
    %269 = vector.extract_strided_slice %262 {offsets = [0, 1, 0], sizes = [1, 1, 32], strides = [1, 1, 1]} : vector<1x3x32xf32> to vector<1x1x32xf32>
    %270 = vector.shape_cast %269 : vector<1x1x32xf32> to vector<1x32xf32>
    %271 = arith.truncf %270 : vector<1x32xf32> to vector<1x32xbf16>
    %c1_197 = arith.constant 1 : index
    %c0_198 = arith.constant 0 : index
    %c0_199 = arith.constant 0 : index
    %272 = vector.load %arg5[%c1_197, %c0_198, %c0_199] : memref<3x32x32xbf16, #tpu.memory_space<vmem>>, vector<1x32x32xbf16>
    %273 = vector.shape_cast %272 : vector<1x32x32xbf16> to vector<32x32xbf16>
    %cst_200 = arith.constant dense<0.000000e+00> : vector<1x32xf32>
    %274 = tpu.matmul %271, %273, %cst_200 {dimension_numbers = #tpu.dot_dimension_numbers<[1], [0], [0], [1], [0, 0, 1, 1], [], []>} : vector<1x32xbf16>, vector<32x32xbf16>, vector<1x32xf32> -> vector<1x32xf32>
    %275 = arith.addf %268, %274 : vector<1x32xf32>
    %276 = vector.extract_strided_slice %262 {offsets = [0, 2, 0], sizes = [1, 1, 32], strides = [1, 1, 1]} : vector<1x3x32xf32> to vector<1x1x32xf32>
    %277 = vector.shape_cast %276 : vector<1x1x32xf32> to vector<1x32xf32>
    %278 = arith.truncf %277 : vector<1x32xf32> to vector<1x32xbf16>
    %c2_201 = arith.constant 2 : index
    %c0_202 = arith.constant 0 : index
    %c0_203 = arith.constant 0 : index
    %279 = vector.load %arg5[%c2_201, %c0_202, %c0_203] : memref<3x32x32xbf16, #tpu.memory_space<vmem>>, vector<1x32x32xbf16>
    %280 = vector.shape_cast %279 : vector<1x32x32xbf16> to vector<32x32xbf16>
    %cst_204 = arith.constant dense<0.000000e+00> : vector<1x32xf32>
    %281 = tpu.matmul %278, %280, %cst_204 {dimension_numbers = #tpu.dot_dimension_numbers<[1], [0], [0], [1], [0, 0, 1, 1], [], []>} : vector<1x32xbf16>, vector<32x32xbf16>, vector<1x32xf32> -> vector<1x32xf32>
    %282 = arith.addf %275, %281 : vector<1x32xf32>
    %283 = arith.addf %282, %85 : vector<1x32xf32>
    %284 = vector.shape_cast %283 : vector<1x32xf32> to vector<1x1x32xf32>
    %285 = arith.addf %284, %231 : vector<1x1x32xf32>
    %c0_205 = arith.constant 0 : index
    %c0_206 = arith.constant 0 : index
    %c0_207 = arith.constant 0 : index
    %286 = vector.load %arg10[%c0_205, %c0_206, %c0_207] : memref<1x1x32xf32, #tpu.memory_space<vmem>>, vector<1x1x32xf32>
    tpu.vector_store %arg10[%c0_205, %c0_206, %c0_207], %285 {strides = array<i32>} : memref<1x1x32xf32, #tpu.memory_space<vmem>>, vector<1x1x32xf32>,
    %287 = vector.shape_cast %285 : vector<1x1x32xf32> to vector<1x32xf32>
    %288 = arith.truncf %287 : vector<1x32xf32> to vector<1x32xbf16>
    %c0_208 = arith.constant 0 : index
    %c0_209 = arith.constant 0 : index
    %289 = vector.load %arg7[%c0_208, %c0_209] : memref<32x4xbf16, #tpu.memory_space<vmem>>, vector<32x4xbf16>
    %cst_210 = arith.constant dense<0.000000e+00> : vector<1x4xf32>
    %290 = tpu.matmul %288, %289, %cst_210 {dimension_numbers = #tpu.dot_dimension_numbers<[1], [0], [0], [1], [0, 0, 1, 1], [], []>} : vector<1x32xbf16>, vector<32x4xbf16>, vector<1x4xf32> -> vector<1x4xf32>
    %c0_211 = arith.constant 0 : index
    %c0_212 = arith.constant 0 : index
    %291 = vector.load %arg8[%c0_211, %c0_212] : memref<1x4xf32, #tpu.memory_space<vmem>>, vector<1x4xf32>
    %292 = arith.addf %290, %291 : vector<1x4xf32>
    %293 = vector.shape_cast %292 : vector<1x4xf32> to vector<1x1x4xf32>
    %c0_213 = arith.constant 0 : index
    %c0_214 = arith.constant 0 : index
    %c0_215 = arith.constant 0 : index
    %294 = vector.load %arg9[%c0_213, %c0_214, %c0_215] : memref<1x1x4xf32, #tpu.memory_space<vmem>>, vector<1x1x4xf32>
    tpu.vector_store %arg9[%c0_213, %c0_214, %c0_215], %293 {strides = array<i32>} : memref<1x1x4xf32, #tpu.memory_space<vmem>>, vector<1x1x4xf32>,
    return
  }
  func.func @transform_0(%arg0: i32, %arg1: memref<16xi32, #tpu.memory_space<smem>>) -> (i32, i32, i32) {
    %c0_i32 = arith.constant 0 : i32
    %c0_i32_0 = arith.constant 0 : i32
    %c0_i32_1 = arith.constant 0 : i32
    %c0_i32_2 = arith.constant 0 : i32
    return %c0_i32, %c0_i32_0, %c0_i32_1 : i32, i32, i32
  }
  func.func @transform_1(%arg0: i32, %arg1: memref<16xi32, #tpu.memory_space<smem>>) -> (i32, i32, i32) {
    %c0_i32 = arith.constant 0 : i32
    %c0_i32_0 = arith.constant 0 : i32
    %c0_i32_1 = arith.constant 0 : i32
    %c0_i32_2 = arith.constant 0 : i32
    return %c0_i32, %c0_i32_0, %c0_i32_1 : i32, i32, i32
  }
  func.func @transform_2(%arg0: i32, %arg1: memref<16xi32, #tpu.memory_space<smem>>) -> (i32, i32) {
    %c0_i32 = arith.constant 0 : i32
    %c0_i32_0 = arith.constant 0 : i32
    %c0_i32_1 = arith.constant 0 : i32
    return %c0_i32, %c0_i32_0 : i32, i32
  }
  func.func @transform_3(%arg0: i32, %arg1: memref<16xi32, #tpu.memory_space<smem>>) -> (i32, i32, i32) {
    %c0_i32 = arith.constant 0 : i32
    %c0_i32_0 = arith.constant 0 : i32
    %c0_i32_1 = arith.constant 0 : i32
    %c0_i32_2 = arith.constant 0 : i32
    return %c0_i32, %c0_i32_0, %c0_i32_1 : i32, i32, i32
  }
  func.func @transform_4(%arg0: i32, %arg1: memref<16xi32, #tpu.memory_space<smem>>) -> (i32, i32) {
    %c0_i32 = arith.constant 0 : i32
    %c0_i32_0 = arith.constant 0 : i32
    %c0_i32_1 = arith.constant 0 : i32
    return %c0_i32, %c0_i32_0 : i32, i32
  }
  func.func @transform_5(%arg0: i32, %arg1: memref<16xi32, #tpu.memory_space<smem>>) -> (i32, i32) {
    %c0_i32 = arith.constant 0 : i32
    %c0_i32_0 = arith.constant 0 : i32
    %c0_i32_1 = arith.constant 0 : i32
    return %c0_i32, %c0_i32_0 : i32, i32
  }
  func.func @transform_6(%arg0: i32, %arg1: memref<16xi32, #tpu.memory_space<smem>>) -> (i32, i32) {
    %c0_i32 = arith.constant 0 : i32
    %c0_i32_0 = arith.constant 0 : i32
    %c0_i32_1 = arith.constant 0 : i32
    return %c0_i32, %c0_i32_0 : i32, i32
  }
  func.func @transform_7(%arg0: i32, %arg1: memref<16xi32, #tpu.memory_space<smem>>) -> (i32, i32, i32) {
    %c0_i32 = arith.constant 0 : i32
    %c0_i32_0 = arith.constant 0 : i32
    %c0_i32_1 = arith.constant 0 : i32
    return %arg0, %c0_i32, %c0_i32_0 : i32, i32, i32
  }
  func.func @transform_8(%arg0: i32, %arg1: memref<16xi32, #tpu.memory_space<smem>>) -> (i32, i32, i32) {
    %c0_i32 = arith.constant 0 : i32
    %c0_i32_0 = arith.constant 0 : i32
    %c0_i32_1 = arith.constant 0 : i32
    return %arg0, %c0_i32, %c0_i32_0 : i32, i32, i32
  }
}

</mosaic_0001>

<bundles_post_ra>
// kernel: tpu_custom_call.1
= control target key start
LH: loop header
LB: loop body
LE: loop exit
PB: predicated region body
PF: predicated region fallthrough
CT: control target
= control target key end

     0   :  { %s2981_s0 = inlined_call_operand.vmem [shape: s32[16], index: 0, kind: input, shape index: {}]   ;;  %s2982_s1 = inlined_call_operand.vmem [shape: bf16[50,1,32], index: 1, kind: input, shape index: {}]   ;;  %s2983_s2 = inlined_call_operand.vmem [shape: bf16[3,32,32], index: 2, kind: input, shape index: {}]   ;;  %s2984_s3 = inlined_call_operand.vmem [shape: f32[1,32], index: 3, kind: input, shape index: {}]   ;;  %s2985_s4 = inlined_call_operand.vmem [shape: bf16[3,32,32], index: 4, kind: input, shape index: {}]   ;;  %s2986_s5 = inlined_call_operand.vmem [shape: f32[1,32], index: 5, kind: input, shape index: {}]   ;;  %s2987_s6 = inlined_call_operand.vmem [shape: bf16[32,4], index: 6, kind: input, shape index: {}]   ;;  %s2988_s7 = inlined_call_operand.vmem [shape: f32[1,4], index: 7, kind: input, shape index: {}]   ;;  %s2989_s8 = inlined_call_operand.hbm [shape: f32[2,1,4], index: 8, kind: output, shape index: {0}]   ;;  %s2990_s9 = inlined_call_operand.hbm [shape: f32[2,1,32], index: 9, kind: output, shape index: {1}]  }
   0x1   :  { %2998 = sst [smem:[#allocation19_spill]] %s2988_s7  ;;  %s15_s11 = sshll.u32 %s2981_s0, 4  ;;  %s16_s11 = int_to_ptr.vmem [resolvable:$true] %s15_s11 }
   0x2   :  { %2999 = sst [smem:[#allocation20_spill]] %s2989_s8  ;;  %s2356_s12 = scalar_lea.vmem %s16_s11, 16 }
   0x3   :  { %p2357_p0 = scmp.ne.s32.totalorder %s16_s11, %s2356_s12  ;;  %p2361_p1 = scmp.lt.s32.totalorder %s16_s11, %s16_s11 }
   0x4   :  { %p2362_p2 = scmp.lt.s32.totalorder %s2356_s12, %s2356_s12 }
   0x6   :  { %p2363_p3 = por %p2362_p2, %p2361_p1 }
   0x8   :  { %p2364_p4 = pnand %p2363_p3, %p2357_p0 }
   0xa   :  { %2367 = shalt.err (!%p2364_p4)  }
   0xb   :  { %s2466_s13 = smov [#allocation5]  }
   0xc   :  { %18 = dma.vmem_to_smem %s16_s11, 16, %s2466_s13, [#allocation4] }
   0xd   :  { %2440 = dma.done.wait [#allocation4], 16 }
   0xe   :  { %2441 = vsyncadd [#allocation4], 4294967280 }
   0xf   :  { %20 = sfence }
  0x10   :  { %21 = vsyncpa [#allocation7], 0 }
  0x11   :  { %23 = vsyncpa [#allocation7 + $0x1], 0 }
  0x12   :  { %24 = vsyncpa [#allocation9], 0 }
  0x13   :  { %26 = vsyncpa [#allocation9 + $0x1], 0  ;;  %s2524_s14 = smov 0   ;;  %s2526_s0 = smov 0  }
  0x14   :  { %s2528_s15 = smov 0   ;;  %s2530_s16 = smov 0  }
  0x15 LB: > { %3000 = sst [smem:[#allocation13_spill]] %s2452_s14  ;;  %s2545_s17 = sadd.s32 4294967295, %s2464_s16   ;;  %s2464_s16 = sphi %s2530_s16, %s3013_s16   ;;  %s2460_s15 = sphi %s2528_s15, %s3015_s15   ;;  %s2456_s0 = sphi %s2526_s0, %s3017_s0   ;;  %s2452_s14 = sphi %s2524_s14, %s3016_s14  }
  0x16   : > { %3001 = sst [smem:[#allocation14_spill]] %s2460_s15  ;;  %s1892_s18 = sadd.s32 4294967294, %s2464_s16  }
  0x17   : > { %3002 = sst [smem:[#allocation15_spill]] %s2464_s16  ;;  %s2549_s19 = sadd.s32 1, %s2464_s16  }
  0x18   : > { %3003 = sst [smem:[#allocation16_spill]] %s2549_s19  ;;  %s186_s20 = sadd.s32 1, %s2460_s15 }
  0x19   : > { %s183_s21 = ssub.s32 %s2464_s16, %s2549_s19  ;;  %p196_p5 = scmp.ne.s32.totalorder %s2460_s15, %s2456_s0 }
  0x1a   : > { %p184_p6 = scmp.eq.s32.totalorder %s183_s21, 0  ;;  %p197_p7 = scmp.eq.s32.totalorder %s2545_s17, 1 }
  0x1b   : > { %p202_p8 = scmp.ne.s32.totalorder %s2456_s0, %s2452_s14  ;;  %p203_p9 = scmp.eq.s32.totalorder %s1892_s18, 1 }
  0x1c   : > { %s2560_s22 = scalar_select %p184_p6, %s2460_s15, %s186_s20  }
  0x1d   : > { %p2562_p10 = por %p197_p7, %p196_p5  ;;  %p2566_p11 = por %p203_p9, %p202_p8 }
  0x1e   : > { %3004 = sst [smem:[#allocation17_spill]] %s2560_s22  ;;  %p1894_p12 = scmp.ge.s32.totalorder %s2464_s16, 1 }
  0x1f   : > { %s3006_s24 = scalar_select %p2566_p11, 1, 0 }
  0x20   : > { %p268_p13 = scmp.lt.s32.totalorder %s2464_s16, 3 }
  0x21   : > { %3007 = sst [smem:[#allocation18_spill]] %s3006_s24 }
  0x22   : > { %p269_p0 = pnand %p1894_p12, %p268_p13 }
  0x23   : > { %v2312_v0 = vld [vmem:[%s2983_s2 + $0x10] sm:$0xff] (!%p269_p0)   ;;  %v2467_v1 = vmov (!%p269_p0), 0.0   ;;  %v2313_v2 = vld [vmem:[%s2983_s2] sm:$0xff] (!%p269_p0)   ;;  %v2314_v3 = vld [vmem:[%s2983_s2 + $0x18] sm:$0xff] (!%p269_p0)   ;;  %vm2468_vm0 = vmmov (!%p269_p0), 0   ;;  %s2586_s10 = sshll.u32 (!%p269_p0), %s2545_s17, 3 }
  0x24   : > { %272 = sbr.rel (%p269_p0) target bundleno = 1996 (0x7cc), region = 48  ;;  %2089 = vmatprep.subr.bf16.mxu0 (!%p269_p0), %v2467_v1  ;;  %2097 = vmatprep.subr.bf16.mxu1 (!%p269_p0), %v2467_v1  ;;  %v2315_v4 = vld [vmem:[%s2983_s2 + $0x8] sm:$0xff] (!%p269_p0)   ;;  %s302_s13 = sld [smem:[#allocation5 + %s2586_s10]] (!%p269_p0)  ;;  %vm306_vm1 = vcmask (!%p269_p0), 253952   ;;  %vm384_vm2 = vcmask (!%p269_p0), 261120   ;;  %v2316_v26 = vld [vmem:[%s2983_s2 + $0x20] sm:$0xff] (!%p269_p0)  }
  0x25   : > { %2090 = vmatpush3.bf16.msra.mxu0 (!%p269_p0), %v2312_v0  ;;  %2093 = vmatprep.mubr.msk.bf16.mxu0 (!%p269_p0), %vm2468_vm0, %v2467_v1  ;;  %s308_s18 = sadd.s32 (!%p269_p0), 1, %s2586_s10  ;;  %s314_s20 = sadd.s32 (!%p269_p0), 2, %s2586_s10  ;;  %350 = vst.msk [vmem:[#allocation3 + $0x7] sm:$0x1] (!%p269_p0), %vm306_vm1, %v2467_v1  ;;  %351 = vst.msk [vmem:[#allocation3 + $0xe] sm:$0x1] (!%p269_p0), %vm306_vm1, %v2467_v1 }
  0x26   : > { %2098 = vmatpush3.bf16.msra.mxu1 (!%p269_p0), %v2313_v2  ;;  %2091 = vmatprep.subr.bf16.mxu0 (!%p269_p0), %v2467_v1  ;;  %s309_s21 = sld [smem:[#allocation5 + %s308_s18]] (!%p269_p0)  ;;  %s320_s26 = sadd.s32 (!%p269_p0), 3, %s2586_s10  ;;  %v2317_v28 = vld [vmem:[%s2983_s2 + $0x28] sm:$0xff] (!%p269_p0)   ;;  %v2318_v30 = vld [vmem:[%s2985_s4] sm:$0xff] (!%p269_p0)   ;;  %v2320_v32 = vld [vmem:[%s2985_s4 + $0x10] sm:$0xff] (!%p269_p0)   ;;  %vm552_vm3 = vcmask (!%p269_p0), 259072  }
  0x27   : > { %2099 = vmatprep.subr.bf16.mxu1 (!%p269_p0), %v2467_v1  ;;  %2101 = vmatprep.mubr.msk.bf16.mxu1 (!%p269_p0), %vm2468_vm0, %v2467_v1  ;;  %s315_s25 = sld [smem:[#allocation5 + %s314_s20]] (!%p269_p0)  ;;  %s326_s27 = sadd.s32 (!%p269_p0), 4, %s2586_s10  ;;  %v2319_v31 = vld [vmem:[%s2985_s4 + $0x8] sm:$0xff] (!%p269_p0)   ;;  %v2321_v33 = vld [vmem:[%s2985_s4 + $0x18] sm:$0xff] (!%p269_p0)   ;;  %v1913_v43 = vld [vmem:[%s2984_s3] ss:$0 sm:$0xff] (!%p269_p0) }
  0x28   : > { %s321_s28 = sld [smem:[#allocation5 + %s320_s26]] (!%p269_p0)  ;;  %s332_s30 = sadd.s32 (!%p269_p0), 5, %s2586_s10  ;;  %v2322_v56 = vld [vmem:[%s2985_s4 + $0x20] sm:$0xff] (!%p269_p0)   ;;  %v2323_v58 = vld [vmem:[%s2985_s4 + $0x28] sm:$0xff] (!%p269_p0)   ;;  %v2326_v61 = vld [vmem:[%s2985_s4 + $0x10] sm:$0xff] (!%p269_p0)   ;;  %vm952_vm4 = vcmask (!%p269_p0), 256000  }
  0x29   : > { %2092 = vmatpush3.bf16.msra.mxu0 (!%p269_p0), %v2314_v3  ;;  %s327_s29 = sld [smem:[#allocation5 + %s326_s27]] (!%p269_p0)  ;;  %s338_s11 = sadd.s32 (!%p269_p0), 6, %s2586_s10  ;;  %v2324_v60 = vld [vmem:[%s2985_s4] sm:$0xff] (!%p269_p0)   ;;  %v2325_v62 = vld [vmem:[%s2985_s4 + $0x8] sm:$0xff] (!%p269_p0)   ;;  %v2327_v63 = vld [vmem:[%s2985_s4 + $0x18] sm:$0xff] (!%p269_p0)   ;;  %v746_v3 = vlaneseq (!%p269_p0) }
  0x2a   : > { %2100 = vmatpush3.bf16.msra.mxu1 (!%p269_p0), %v2315_v4  ;;  %2105 = vmatprep.subr.bf16.mxu0 (!%p269_p0), %v2467_v1  ;;  %s303_s20 = scalar_lea.vmem (!%p269_p0), %s2982_s1, %s302_s13  ;;  %s333_s22 = sld [smem:[#allocation5 + %s332_s30]] (!%p269_p0) }
  0x2b   : > { %2113 = vmatprep.subr.bf16.mxu1 %v2467_v1  ;;  %v304_v5 = vld [vmem:[%s303_s20] sm:$0x1]  ;;  %s339_s15 = sld [smem:[#allocation5 + %s338_s11]]  ;;  %s344_s19 = sadd.s32 7, %s2586_s10 }
  0x2c   : > { %v305_v6 = vunpack.c.l.bf16 %v304_v5  ;;  %s310_s16 = scalar_lea.vmem %s2982_s1, %s309_s21  ;;  %s345_s7 = sld [smem:[#allocation5 + %s344_s19]] }
  0x2d   : > { %s316_s27 = scalar_lea.vmem %s2982_s1, %s315_s25  ;;  %v311_v7 = vld [vmem:[%s310_s16] sm:$0x1]  ;;  %s2469_s11 = smov [#allocation8]  }
  0x2e   : > { %v317_v8 = vld [vmem:[%s316_s27] sm:$0x1]  ;;  %307 = vst.msk [vmem:[#allocation2] sm:$0x1] %vm306_vm1, %v305_v6  ;;  %v312_v9 = vunpack.c.l.bf16 %v311_v7  ;;  %s322_s10 = scalar_lea.vmem %s2982_s1, %s321_s28  ;;  %v747_v6 = vshrl.u32 %v746_v3, 7  ;;  %v2338_v3 = vld [vmem:[%s2985_s4 + $0x10] sm:$0xff]  }
  0x2f   : > { %v318_v10 = vunpack.c.l.bf16 %v317_v8  ;;  %s328_s14 = scalar_lea.vmem %s2982_s1, %s327_s29  ;;  %v323_v11 = vld [vmem:[%s322_s10] sm:$0x1]  ;;  %s2372_s12 = sshll.u32 %s2469_s11, 4  ;;  %s2373_s12 = int_to_ptr.vmem [resolvable:$false] %s2372_s12 }
  0x30   : > { %v329_v12 = vld [vmem:[%s328_s14] sm:$0x1]  ;;  %313 = vst.msk [vmem:[#allocation2 + $0x1] sm:$0x1] %vm306_vm1, %v312_v9  ;;  %v324_v13 = vunpack.c.l.bf16 %v323_v11  ;;  %s334_s19 = scalar_lea.vmem %s2982_s1, %s333_s22  ;;  %s2019_s22 = sshll.u32 %s2545_s17, 4 }
  0x31   : > { %319 = vst.msk [vmem:[#allocation2 + $0x2] sm:$0x1] %vm306_vm1, %v318_v10  ;;  %v330_v14 = vunpack.c.l.bf16 %v329_v12  ;;  %v335_v15 = vld [vmem:[%s334_s19] sm:$0x1]  ;;  %s340_s25 = scalar_lea.vmem %s2982_s1, %s339_s15  ;;  %v748_v12 = vsub.s32 0, %v747_v6  ;;  %s2909_s27 = scalar_lea.hbm %s2990_s9, %s2019_s22 }
  0x32   : > { %325 = vst.msk [vmem:[#allocation2 + $0x3] sm:$0x1] %vm306_vm1, %v324_v13  ;;  %v336_v16 = vunpack.c.l.bf16 %v335_v15  ;;  %v341_v17 = vld [vmem:[%s340_s25] sm:$0x1]  ;;  %s346_s18 = scalar_lea.vmem %s2982_s1, %s345_s7  ;;  %s2896_s7 = sand.u32 1, %s2456_s0  }
  0x33   : > { %331 = vst.msk [vmem:[#allocation2 + $0x4] sm:$0x1] %vm306_vm1, %v330_v14  ;;  %v342_v18 = vunpack.c.l.bf16 %v341_v17  ;;  %v347_v19 = vld [vmem:[%s346_s18] sm:$0x1]  ;;  %s299_s15 = scalar_lea.vmem [#allocation8], %s2896_s7  ;;  %s1788_s30 = scalar_lea.sflag [#allocation9], %s2896_s7 }
  0x34   : > { %337 = vst.msk [vmem:[#allocation2 + $0x5] sm:$0x1] %vm306_vm1, %v336_v16  ;;  %v348_v20 = vunpack.c.l.bf16 %v347_v19  ;;  %v2714_v13 = vld [vmem:[%s2986_s5] sm:$0x1]  ;;  %s1813_s13 = sshll.u32 %s299_s15, 4  ;;  %s2374_s14 = scalar_lea.vmem %s2373_s12, 32  ;;  %s1814_s13 = int_to_ptr.vmem [resolvable:$true] %s1813_s13 }
  0x35   : > { %343 = vst.msk [vmem:[#allocation2 + $0x6] sm:$0x1] %vm306_vm1, %v342_v18  ;;  %v2717_v14 = vrot.slane %v2714_v13, %v748_v12  ;;  %s2368_s10 = scalar_lea.vmem %s1814_s13, 16  ;;  %p2375_p4 = scmp.lt.s32.totalorder %s1814_s13, %s2373_s12 }
  0x36   : > { %349 = vst.msk [vmem:[#allocation2 + $0x7] sm:$0x1] %vm306_vm1, %v348_v20  ;;  %p2369_p1 = scmp.ne.s32.totalorder %s1814_s13, %s2368_s10  ;;  %p2376_p5 = scmp.lt.s32.totalorder %s2374_s14, %s2368_s10 }
  0x38   : > { %p2370_p2 = pnand %p2369_p1, %p2562_p10  ;;  %p2377_p6 = por %p2376_p5, %p2375_p4 }
  0x3a   : > { %p2371_p3 = pneg %p2370_p2 }
  0x3c   : > { %p2378_p7 = pnand %p2377_p6, %p2371_p3 }
  0x3d   : > { %v354_v21 = vld [vmem:[#allocation2] sm:$0xff] }
  0x3e   : > { %v355_v22 = vpack.c.bf16 %v354_v21, %v354_v21 }
  0x40   : > { %v366_v23 = vshrl.u32 %v355_v22, 16  ;;  %v368_v24 = vshll.u32 %v355_v22, 16  ;;  %2102 = vmatmul.mubr.msk.bf16.vlgmr.msra.gmra.mrb[0].mxu1 %vm384_vm2, %v355_v22  ;;  %v488_v29 = vrot.slane %v355_v22, 1 }
  0x41   : > { %2117 = vmatprep.mubr.msk.bf16.mxu1 %vm2468_vm0, %v2467_v1  ;;  %2114 = vmatpush3.bf16.msra.mxu1 %v2320_v32  ;;  %v2332_v32 = vld [vmem:[%s2985_s4 + $0x10] sm:$0xff]  }
  0x42   : > { %v370_v25 = vrot.slane %v368_v24, 1  ;;  %2115 = vmatprep.subr.bf16.mxu1 %v2467_v1 }
  0x44   : > { %v371_v27 = vor.u32 %v370_v25, %v366_v23 }
  0x45   : > { %2116 = vmatpush3.bf16.msra.mxu1 %v2321_v33  ;;  %v2331_v33 = vld [vmem:[%s2985_s4 + $0x8] sm:$0xff]  }
  0x46   : > { %2094 = vmatmul.mubr.msk.bf16.vlgmr.msra.gmra.mrb[0].mxu0 %vm384_vm2, %v371_v27  ;;  %2129 = vmatprep.subr.bf16.mxu1 %v2467_v1  ;;  %v2328_v27 = vld [vmem:[%s2985_s4 + $0x20] sm:$0xff]  }
  0x47   : > { %2106 = vmatpush3.bf16.msra.mxu0 %v2316_v26  ;;  %2109 = vmatprep.mubr.msk.bf16.mxu0 %vm2468_vm0, %v2467_v1 }
  0x48   : > { %2107 = vmatprep.subr.bf16.mxu0 %v2467_v1 }
  0x4b   : > { %2108 = vmatpush3.bf16.msra.mxu0 %v2317_v28 }
  0x4c   : > { %2121 = vmatprep.subr.bf16.mxu0 %v2467_v1 }
  0x4e   : > { %2110 = vmatmul.mubr.msk.bf16.vlgmr.msra.gmra.mrb[4].mxu0 %vm384_vm2, %v488_v29  ;;  %v2329_v29 = vld [vmem:[%s2985_s4 + $0x28] sm:$0xff]  }
  0x4f   : > { %2125 = vmatprep.mubr.msk.bf16.mxu0 %vm2468_vm0, %v2467_v1  ;;  %2122 = vmatpush3.bf16.msra.mxu0 %v2318_v30 }
  0x50   : > { %2123 = vmatprep.subr.bf16.mxu0 %v2467_v1 }
  0x53   : > { %2124 = vmatpush3.bf16.msra.mxu0 %v2319_v31  ;;  %v2330_v31 = vld [vmem:[%s2985_s4] sm:$0xff]  }
  0x54   : > { %2137 = vmatprep.subr.bf16.mxu0 %v2467_v1 }
 0x113   : > { %v476_v34 = vpop.f32.mrb[0].mxu1 }
 0x114   : > { %v2103_v35 = vpop.f32.mrb[1].mxu1 }
 0x115   : > { %v479_v36 = vpop.f32.mrb[2].mxu1 }
 0x116   : > { %v2104_v37 = vpop.f32.mrb[3].mxu1 }
 0x119   : > { %v422_v38 = vpop.f32.mrb[0].mxu0 }
 0x11a   : > { %v477_v39 = vadd.f32 %v476_v34, %v422_v38  ;;  %v2095_v40 = vpop.f32.mrb[1].mxu0  ;;  %v2333_v34 = vld [vmem:[%s2985_s4 + $0x18] sm:$0xff]  }
 0x11b   : > { %v425_v41 = vpop.f32.mrb[2].mxu0 }
 0x11c   : > { %v2096_v42 = vpop.f32.mrb[3].mxu0 }
 0x121   : > { %v538_v44 = vpop.f32.mrb[4].mxu0 }
 0x122   : > { %v544_v45 = vadd.f32 %v538_v44, %v477_v39  ;;  %v2111_v46 = vpop.f32.mrb[5].mxu0 }
 0x123   : > { %v541_v47 = vpop.f32.mrb[6].mxu0 }
 0x124   : > { %v551_v48 = vadd.f32 %v1913_v43, %v544_v45  ;;  %v2112_v49 = vpop.f32.mrb[7].mxu0 }
 0x126   : > { %553 = vst.msk [vmem:[#allocation3 + $0x8] sm:$0x3f] %vm552_vm3, %v551_v48 }
 0x12d   : > { %v554_v50 = vld [vmem:[#allocation3 + $0x7] sm:$0xff] }
 0x12e   : > { %v555_v51 = vmax.f32 %v554_v50, 0.0 }
 0x130   : > { %v556_v52 = vpack.c.bf16 %v555_v51, %v555_v51 }
 0x132   : > { %2126 = vmatmul.mubr.msk.bf16.vlgmr.msra.gmra.mrb[8].mxu0 %vm384_vm2, %v556_v52  ;;  %v569_v53 = vshll.u32 %v556_v52, 16  ;;  %v567_v54 = vshrl.u32 %v556_v52, 16  ;;  %v688_v59 = vrot.slane %v556_v52, 1 }
 0x133   : > { %2141 = vmatprep.mubr.msk.bf16.mxu0 %vm2468_vm0, %v2467_v1  ;;  %2138 = vmatpush3.bf16.msra.mxu0 %v2326_v61  ;;  %v2334_v61 = vld [vmem:[%s2985_s4 + $0x20] sm:$0xff]  }
 0x134   : > { %v571_v55 = vrot.slane %v569_v53, 1  ;;  %2139 = vmatprep.subr.bf16.mxu0 %v2467_v1 }
 0x136   : > { %v572_v57 = vor.u32 %v571_v55, %v567_v54 }
 0x137   : > { %2140 = vmatpush3.bf16.msra.mxu0 %v2327_v63  ;;  %v2335_v63 = vld [vmem:[%s2985_s4 + $0x28] sm:$0xff]  }
 0x138   : > { %2118 = vmatmul.mubr.msk.bf16.vlgmr.msra.gmra.mrb[4].mxu1 %vm384_vm2, %v572_v57  ;;  %2153 = vmatprep.subr.bf16.mxu0 %v2467_v1 }
 0x139   : > { %2130 = vmatpush3.bf16.msra.mxu1 %v2322_v56  ;;  %2133 = vmatprep.mubr.msk.bf16.mxu1 %vm2468_vm0, %v2467_v1 }
 0x13a   : > { %2131 = vmatprep.subr.bf16.mxu1 %v2467_v1 }
 0x13d   : > { %2132 = vmatpush3.bf16.msra.mxu1 %v2323_v58 }
 0x13e   : > { %2145 = vmatprep.subr.bf16.mxu1 %v2467_v1 }
 0x140   : > { %2134 = vmatmul.mubr.msk.bf16.vlgmr.msra.gmra.mrb[8].mxu1 %vm384_vm2, %v688_v59 }
 0x141   : > { %2149 = vmatprep.mubr.msk.bf16.mxu1 %vm2468_vm0, %v2467_v1  ;;  %2146 = vmatpush3.bf16.msra.mxu1 %v2324_v60 }
 0x142   : > { %2147 = vmatprep.subr.bf16.mxu1 %v2467_v1 }
 0x145   : > { %2148 = vmatpush3.bf16.msra.mxu1 %v2325_v62 }
 0x146   : > { %2161 = vmatprep.subr.bf16.mxu1 %v2467_v1 }
 0x205   : > { %v676_v0 = vpop.f32.mrb[8].mxu0 }
 0x206   : > { %v2127_v2 = vpop.f32.mrb[9].mxu0 }
 0x207   : > { %v679_v4 = vpop.f32.mrb[10].mxu0  ;;  %v2336_v2 = vld [vmem:[%s2985_s4] sm:$0xff]  }
 0x208   : > { %v2128_v5 = vpop.f32.mrb[11].mxu0  ;;  %v2337_v4 = vld [vmem:[%s2985_s4 + $0x8] sm:$0xff]  }
 0x209   : > { %v2339_v5 = vld [vmem:[%s2985_s4 + $0x18] sm:$0xff]  }
 0x20b   : > { %v622_v7 = vpop.f32.mrb[4].mxu1 }
 0x20c   : > { %v677_v8 = vadd.f32 %v676_v0, %v622_v7  ;;  %v2119_v9 = vpop.f32.mrb[5].mxu1 }
 0x20d   : > { %v625_v10 = vpop.f32.mrb[6].mxu1 }
 0x20e   : > { %v2120_v11 = vpop.f32.mrb[7].mxu1 }
 0x213   : > { %v738_v15 = vpop.f32.mrb[8].mxu1 }
 0x214   : > { %v744_v16 = vadd.f32 %v738_v15, %v677_v8  ;;  %v2135_v17 = vpop.f32.mrb[9].mxu1 }
 0x215   : > { %v741_v18 = vpop.f32.mrb[10].mxu1 }
 0x216   : > { %v751_v19 = vadd.f32 %v2717_v14, %v744_v16  ;;  %v2136_v20 = vpop.f32.mrb[11].mxu1 }
 0x218   : > { %752 = vst.msk [vmem:[#allocation3 + $0x8] sm:$0x3f] %vm552_vm3, %v751_v19 }
 0x21f   : > { %v753_v21 = vld [vmem:[#allocation3 + $0x7] sm:$0xff] }
 0x220   : > { %v754_v22 = vmax.f32 %v753_v21, 0.0 }
 0x222   : > { %v755_v23 = vpack.c.bf16 %v754_v22, %v754_v22 }
 0x224   : > { %2150 = vmatmul.mubr.msk.bf16.vlgmr.msra.gmra.mrb[12].mxu1 %vm384_vm2, %v755_v23  ;;  %v767_v24 = vshll.u32 %v755_v23, 16  ;;  %v765_v25 = vshrl.u32 %v755_v23, 16  ;;  %v885_v30 = vrot.slane %v755_v23, 1 }
 0x225   : > { %2165 = vmatprep.mubr.msk.bf16.mxu1 %vm2468_vm0, %v2467_v1  ;;  %2162 = vmatpush3.bf16.msra.mxu1 %v2332_v32 }
 0x226   : > { %v769_v26 = vrot.slane %v767_v24, 1  ;;  %2163 = vmatprep.subr.bf16.mxu1 %v2467_v1 }
 0x228   : > { %v770_v28 = vor.u32 %v769_v26, %v765_v25 }
 0x229   : > { %2164 = vmatpush3.bf16.msra.mxu1 %v2333_v34  ;;  %v2343_v34 = vld [vmem:[%s2985_s4 + $0x10] sm:$0xff]  }
 0x22a   : > { %2142 = vmatmul.mubr.msk.bf16.vlgmr.msra.gmra.mrb[12].mxu0 %vm384_vm2, %v770_v28  ;;  %2177 = vmatprep.subr.bf16.mxu1 %v2467_v1 }
 0x22b   : > { %2154 = vmatpush3.bf16.msra.mxu0 %v2328_v27  ;;  %2157 = vmatprep.mubr.msk.bf16.mxu0 %vm2468_vm0, %v2467_v1 }
 0x22c   : > { %2155 = vmatprep.subr.bf16.mxu0 %v2467_v1 }
 0x22f   : > { %2156 = vmatpush3.bf16.msra.mxu0 %v2329_v29  ;;  %v2340_v29 = vld [vmem:[%s2985_s4 + $0x20] sm:$0xff]  }
 0x230   : > { %2169 = vmatprep.subr.bf16.mxu0 %v2467_v1 }
 0x232   : > { %2158 = vmatmul.mubr.msk.bf16.vlgmr.msra.gmra.mrb[16].mxu0 %vm384_vm2, %v885_v30 }
 0x233   : > { %2173 = vmatprep.mubr.msk.bf16.mxu0 %vm2468_vm0, %v2467_v1  ;;  %2170 = vmatpush3.bf16.msra.mxu0 %v2330_v31  ;;  %v2341_v31 = vld [vmem:[%s2985_s4 + $0x28] sm:$0xff]  }
 0x234   : > { %2171 = vmatprep.subr.bf16.mxu0 %v2467_v1 }
 0x237   : > { %2172 = vmatpush3.bf16.msra.mxu0 %v2331_v33  ;;  %v2342_v33 = vld [vmem:[%s2985_s4] sm:$0xff]  }
 0x238   : > { %2185 = vmatprep.subr.bf16.mxu0 %v2467_v1 }
 0x2f7   : > { %v874_v35 = vpop.f32.mrb[12].mxu1 }
 0x2f8   : > { %v2151_v36 = vpop.f32.mrb[13].mxu1 }
 0x2f9   : > { %v877_v37 = vpop.f32.mrb[14].mxu1  ;;  %v2345_v36 = vld [vmem:[%s2985_s4 + $0x18] sm:$0xff]  }
 0x2fa   : > { %v2152_v38 = vpop.f32.mrb[15].mxu1 }
 0x2fd   : > { %v820_v39 = vpop.f32.mrb[12].mxu0 }
 0x2fe   : > { %v875_v40 = vadd.f32 %v874_v35, %v820_v39  ;;  %v2143_v41 = vpop.f32.mrb[13].mxu0  ;;  %v2344_v35 = vld [vmem:[%s2985_s4 + $0x8] sm:$0xff]  }
 0x2ff   : > { %v823_v42 = vpop.f32.mrb[14].mxu0 }
 0x300   : > { %v2144_v43 = vpop.f32.mrb[15].mxu0 }
 0x305   : > { %v935_v44 = vpop.f32.mrb[16].mxu0 }
 0x306   : > { %v941_v45 = vadd.f32 %v935_v44, %v875_v40  ;;  %v2159_v46 = vpop.f32.mrb[17].mxu0 }
 0x307   : > { %v938_v47 = vpop.f32.mrb[18].mxu0 }
 0x308   : > { %v942_v48 = vadd.f32 %v941_v45, %v2717_v14  ;;  %v2160_v49 = vpop.f32.mrb[19].mxu0 }
 0x30a   : > { %943 = vst.msk [vmem:[#allocation3 + $0x8] sm:$0x3f] %vm552_vm3, %v942_v48 }
 0x311   : > { %v945_v50 = vld [vmem:[#allocation3 + $0x7] ss:$2 sm:$0x7]  ;;  %v947_v51 = vld [vmem:[#allocation3 + $0x8] ss:$2 sm:$0x7] }
 0x312   : > { %v949_v52 = vld [vmem:[#allocation3 + $0x9] ss:$2 sm:$0x7]  ;;  %v950_v53 = vmax.f32 %v945_v50, %v947_v51 }
 0x313   : > { %954 = vst.msk [vmem:[#allocation3 + $0xb] sm:$0x1] %vm306_vm1, %v2467_v1 }
 0x314   : > { %v2758_v54 = vmax.f32 %v950_v53, %v949_v52  ;;  %v1338_v53 = vld [vmem:[#allocation3 + $0x7] ss:$2 sm:$0x1] }
 0x316   : > { %953 = vst.msk [vmem:[#allocation3 + $0x8] sm:$0x7] %vm952_vm4, %v2758_v54 }
 0x31d   : > { %v955_v55 = vld [vmem:[#allocation3 + $0x7] sm:$0x1f] }
 0x31e   : > { %v956_v56 = vmax.f32 %v955_v55, 0.0 }
 0x320   : > { %v957_v57 = vpack.c.bf16 %v956_v56, %v956_v56 }
 0x322   : > { %2174 = vmatmul.mubr.msk.bf16.vlgmr.msra.gmra.mrb[20].mxu0 %vm384_vm2, %v957_v57  ;;  %v969_v58 = vshll.u32 %v957_v57, 16  ;;  %v967_v59 = vshrl.u32 %v957_v57, 16  ;;  %v1087_v0 = vrot.slane %v957_v57, 1 }
 0x323   : > { %2189 = vmatprep.mubr.msk.bf16.mxu0 %vm2468_vm0, %v2467_v1  ;;  %2186 = vmatpush3.bf16.msra.mxu0 %v2338_v3  ;;  %v2350_v3 = vld [vmem:[%s2985_s4 + $0x8] sm:$0xff]  }
 0x324   : > { %v971_v60 = vrot.slane %v969_v58, 1  ;;  %2187 = vmatprep.subr.bf16.mxu0 %v2467_v1 }
 0x326   : > { %v972_v62 = vor.u32 %v971_v60, %v967_v59 }
 0x327   : > { %2188 = vmatpush3.bf16.msra.mxu0 %v2339_v5 }
 0x328   : > { %2166 = vmatmul.mubr.msk.bf16.vlgmr.msra.gmra.mrb[16].mxu1 %vm384_vm2, %v972_v62  ;;  %2201 = vmatprep.subr.bf16.mxu0 %v2467_v1  ;;  %v2347_v62 = vld [vmem:[%s2985_s4 + $0x28] sm:$0xff]  }
 0x329   : > { %2178 = vmatpush3.bf16.msra.mxu1 %v2334_v61  ;;  %2181 = vmatprep.mubr.msk.bf16.mxu1 %vm2468_vm0, %v2467_v1 }
 0x32a   : > { %2179 = vmatprep.subr.bf16.mxu1 %v2467_v1 }
 0x32d   : > { %2180 = vmatpush3.bf16.msra.mxu1 %v2335_v63 }
 0x32e   : > { %2193 = vmatprep.subr.bf16.mxu1 %v2467_v1 }
 0x330   : > { %2182 = vmatmul.mubr.msk.bf16.vlgmr.msra.gmra.mrb[20].mxu1 %vm384_vm2, %v1087_v0  ;;  %v2348_v0 = vld [vmem:[%s2985_s4] sm:$0xff]  }
 0x331   : > { %2197 = vmatprep.mubr.msk.bf16.mxu1 %vm2468_vm0, %v2467_v1  ;;  %2194 = vmatpush3.bf16.msra.mxu1 %v2336_v2  ;;  %v2349_v2 = vld [vmem:[%s2985_s4 + $0x10] sm:$0xff]  }
 0x332   : > { %2195 = vmatprep.subr.bf16.mxu1 %v2467_v1 }
 0x335   : > { %2196 = vmatpush3.bf16.msra.mxu1 %v2337_v4  ;;  %v2351_v4 = vld [vmem:[%s2985_s4 + $0x18] sm:$0xff]  }
 0x336   : > { %2209 = vmatprep.subr.bf16.mxu1 %v2467_v1 }
 0x3f5   : > { %v1076_v6 = vpop.f32.mrb[20].mxu0 }
 0x3f6   : > { %v2175_v7 = vpop.f32.mrb[21].mxu0 }
 0x3f7   : > { %v1079_v8 = vpop.f32.mrb[22].mxu0 }
 0x3f8   : > { %v2176_v9 = vpop.f32.mrb[23].mxu0 }
 0x3fb   : > { %v1022_v10 = vpop.f32.mrb[16].mxu1 }
 0x3fc   : > { %v1077_v11 = vadd.f32 %v1076_v6, %v1022_v10  ;;  %v2167_v12 = vpop.f32.mrb[17].mxu1 }
 0x3fd   : > { %v1025_v15 = vpop.f32.mrb[18].mxu1 }
 0x3fe   : > { %v2168_v16 = vpop.f32.mrb[19].mxu1 }
 0x403   : > { %v1137_v17 = vpop.f32.mrb[20].mxu1 }
 0x404   : > { %v1143_v18 = vadd.f32 %v1137_v17, %v1077_v11  ;;  %v2183_v19 = vpop.f32.mrb[21].mxu1 }
 0x405   : > { %v1140_v20 = vpop.f32.mrb[22].mxu1 }
 0x406   : > { %v1144_v21 = vadd.f32 %v1143_v18, %v2717_v14  ;;  %v2184_v22 = vpop.f32.mrb[23].mxu1 }
 0x408   : > { %1145 = vst.msk [vmem:[#allocation3 + $0x8] sm:$0x7] %vm952_vm4, %v1144_v21 }
 0x40f   : > { %v1146_v23 = vld [vmem:[#allocation3 + $0x7] sm:$0x1f] }
 0x410   : > { %v1147_v24 = vmax.f32 %v1146_v23, 0.0 }
 0x412   : > { %v1148_v25 = vpack.c.bf16 %v1147_v24, %v1147_v24 }
 0x414   : > { %2198 = vmatmul.mubr.msk.bf16.vlgmr.msra.gmra.mrb[24].mxu1 %vm384_vm2, %v1148_v25  ;;  %v1160_v26 = vshll.u32 %v1148_v25, 16  ;;  %v1158_v27 = vshrl.u32 %v1148_v25, 16  ;;  %v1278_v32 = vrot.slane %v1148_v25, 1  ;;  %v2352_v25 = vld [vmem:[%s2985_s4 + $0x20] sm:$0xff]  }
 0x415   : > { %2213 = vmatprep.mubr.msk.bf16.mxu1 %vm2468_vm0, %v2467_v1  ;;  %2210 = vmatpush3.bf16.msra.mxu1 %v2343_v34 }
 0x416   : > { %v1162_v28 = vrot.slane %v1160_v26, 1  ;;  %2211 = vmatprep.subr.bf16.mxu1 %v2467_v1 }
 0x418   : > { %v1163_v30 = vor.u32 %v1162_v28, %v1158_v27  ;;  %v2353_v27 = vld [vmem:[%s2985_s4 + $0x28] sm:$0xff]  }
 0x419   : > { %2212 = vmatpush3.bf16.msra.mxu1 %v2345_v36 }
 0x41a   : > { %2190 = vmatmul.mubr.msk.bf16.vlgmr.msra.gmra.mrb[24].mxu0 %vm384_vm2, %v1163_v30  ;;  %2225 = vmatprep.subr.bf16.mxu1 %v2467_v1  ;;  %v2355_v30 = vld [vmem:[%s2987_s6 + $0x8] sm:$0xff]  }
 0x41b   : > { %2202 = vmatpush3.bf16.msra.mxu0 %v2340_v29  ;;  %2205 = vmatprep.mubr.msk.bf16.mxu0 %vm2468_vm0, %v2467_v1  ;;  %v2354_v29 = vld [vmem:[%s2987_s6] sm:$0xff]  }
 0x41c   : > { %2203 = vmatprep.subr.bf16.mxu0 %v2467_v1 }
 0x41f   : > { %2204 = vmatpush3.bf16.msra.mxu0 %v2341_v31 }
 0x420   : > { %2217 = vmatprep.subr.bf16.mxu0 %v2467_v1 }
 0x422   : > { %2206 = vmatmul.mubr.msk.bf16.vlgmr.msra.gmra.mrb[28].mxu0 %vm384_vm2, %v1278_v32 }
 0x423   : > { %2221 = vmatprep.mubr.msk.bf16.mxu0 %vm2468_vm0, %v2467_v1  ;;  %2218 = vmatpush3.bf16.msra.mxu0 %v2342_v33 }
 0x424   : > { %2219 = vmatprep.subr.bf16.mxu0 %v2467_v1 }
 0x427   : > { %2220 = vmatpush3.bf16.msra.mxu0 %v2344_v35 }
 0x428   : > { %2233 = vmatprep.subr.bf16.mxu0 %v2467_v1 }
 0x4e7   : > { %v1267_v37 = vpop.f32.mrb[24].mxu1 }
 0x4e8   : > { %v2199_v38 = vpop.f32.mrb[25].mxu1 }
 0x4e9   : > { %v1270_v39 = vpop.f32.mrb[26].mxu1 }
 0x4ea   : > { %v2200_v40 = vpop.f32.mrb[27].mxu1 }
 0x4ed   : > { %v1213_v41 = vpop.f32.mrb[24].mxu0 }
 0x4ee   : > { %v1268_v42 = vadd.f32 %v1267_v37, %v1213_v41  ;;  %v2191_v43 = vpop.f32.mrb[25].mxu0 }
 0x4ef   : > { %v1216_v44 = vpop.f32.mrb[26].mxu0 }
 0x4f0   : > { %v2192_v45 = vpop.f32.mrb[27].mxu0 }
 0x4f5   : > { %v1328_v46 = vpop.f32.mrb[28].mxu0 }
 0x4f6   : > { %v1334_v47 = vadd.f32 %v1328_v46, %v1268_v42  ;;  %v2207_v48 = vpop.f32.mrb[29].mxu0 }
 0x4f7   : > { %v1331_v49 = vpop.f32.mrb[30].mxu0 }
 0x4f8   : > { %v1335_v50 = vadd.f32 %v1334_v47, %v2717_v14  ;;  %v2208_v51 = vpop.f32.mrb[31].mxu0 }
 0x4fa   : > { %v1336_v52 = vadd.f32 %v1335_v50, %v2758_v54  ;;  %v2346_v54 = vld [vmem:[%s2985_s4 + $0x20] sm:$0xff]  }
 0x4fc   : > { %1337 = vst.msk [vmem:[#allocation3 + $0x8] sm:$0x7] %vm952_vm4, %v1336_v52 }
 0x503   : > { %v1339_v55 = vld [vmem:[#allocation3 + $0x8] ss:$2 sm:$0x1]  ;;  %v1340_v56 = vld [vmem:[#allocation3 + $0x9] ss:$2 sm:$0x1] }
 0x504   : > { %v1341_v57 = vmax.f32 %v1338_v53, %v1339_v55  ;;  %1344 = vst.msk [vmem:[#allocation3 + $0x9] sm:$0x1] %vm306_vm1, %v2467_v1 }
 0x506   : > { %v2835_v58 = vmax.f32 %v1341_v57, %v1340_v56 }
 0x508   : > { %1343 = vst.msk [vmem:[#allocation3 + $0x8] sm:$0x1] %vm306_vm1, %v2835_v58 }
 0x50f   : > { %v1345_v59 = vld [vmem:[#allocation3 + $0x7] sm:$0x7] }
 0x510   : > { %v1346_v60 = vmax.f32 %v1345_v59, 0.0 }
 0x512   : > { %v1347_v14 = vpack.c.bf16 %v1346_v60, %v1346_v60 }
 0x514   : > { %2222 = vmatmul.mubr.msk.bf16.vlgmr.msra.gmra.mrb[32].mxu0 %vm384_vm2, %v1347_v14  ;;  %v1357_v61 = vshrl.u32 %v1347_v14, 16  ;;  %v1473_v63 = vrot.slane %v1347_v14, 1 }
 0x515   : > { %2237 = vmatprep.mubr.msk.bf16.mxu0 %vm2468_vm0, %v2467_v1  ;;  %2234 = vmatpush3.bf16.msra.mxu0 %v2349_v2 }
 0x516   : > { %2214 = vmatmul.mubr.msk.bf16.vlgmr.msra.gmra.mrb[28].mxu1 %vm384_vm2, %v1357_v61  ;;  %2235 = vmatprep.subr.bf16.mxu0 %v2467_v1 }
 0x517   : > { %2226 = vmatpush3.bf16.msra.mxu1 %v2346_v54  ;;  %2229 = vmatprep.mubr.msk.bf16.mxu1 %vm2468_vm0, %v2467_v1 }
 0x518   : > { %2227 = vmatprep.subr.bf16.mxu1 %v2467_v1 }
 0x519   : > { %2236 = vmatpush3.bf16.msra.mxu0 %v2351_v4 }
 0x51a   : > { %2249 = vmatprep.subr.bf16.mxu0 %v2467_v1 }
 0x51b   : > { %2228 = vmatpush3.bf16.msra.mxu1 %v2347_v62 }
 0x51c   : > { %2241 = vmatprep.subr.bf16.mxu1 %v2467_v1 }
 0x51e   : > { %2230 = vmatmul.mubr.msk.bf16.vlgmr.msra.gmra.mrb[32].mxu1 %vm384_vm2, %v1473_v63 }
 0x51f   : > { %2245 = vmatprep.mubr.msk.bf16.mxu1 %vm2468_vm0, %v2467_v1  ;;  %2242 = vmatpush3.bf16.msra.mxu1 %v2348_v0 }
 0x520   : > { %2243 = vmatprep.subr.bf16.mxu1 %v2467_v1 }
 0x523   : > { %2244 = vmatpush3.bf16.msra.mxu1 %v2350_v3 }
 0x524   : > { %2257 = vmatprep.subr.bf16.mxu1 %v2467_v1 }
 0x5e7   : > { %v1462_v5 = vpop.f32.mrb[32].mxu0 }
 0x5e8   : > { %v2223_v6 = vpop.f32.mrb[33].mxu0 }
 0x5e9   : > { %v1408_v7 = vpop.f32.mrb[28].mxu1  ;;  %v1465_v8 = vpop.f32.mrb[34].mxu0 }
 0x5ea   : > { %v1463_v9 = vadd.f32 %v1462_v5, %v1408_v7  ;;  %v2215_v10 = vpop.f32.mrb[29].mxu1  ;;  %v2224_v11 = vpop.f32.mrb[35].mxu0 }
 0x5eb   : > { %v1411_v12 = vpop.f32.mrb[30].mxu1 }
 0x5ec   : > { %v2216_v15 = vpop.f32.mrb[31].mxu1 }
 0x5f1   : > { %v1523_v16 = vpop.f32.mrb[32].mxu1 }
 0x5f2   : > { %v1529_v17 = vadd.f32 %v1523_v16, %v1463_v9  ;;  %v2231_v18 = vpop.f32.mrb[33].mxu1 }
 0x5f3   : > { %v1526_v19 = vpop.f32.mrb[34].mxu1 }
 0x5f4   : > { %v1530_v20 = vadd.f32 %v1529_v17, %v2714_v13  ;;  %v2232_v21 = vpop.f32.mrb[35].mxu1 }
 0x5f6   : > { %1531 = vst.msk [vmem:[#allocation3 + $0x8] sm:$0x1] %vm306_vm1, %v1530_v20 }
 0x5fd   : > { %v1532_v22 = vld [vmem:[#allocation3 + $0x7] sm:$0x7] }
 0x5fe   : > { %v1533_v23 = vmax.f32 %v1532_v22, 0.0 }
 0x600   : > { %v1534_v24 = vpack.c.bf16 %v1533_v23, %v1533_v23 }
 0x602   : > { %2246 = vmatmul.mubr.msk.bf16.vlgmr.msra.gmra.mrb[36].mxu1 %vm384_vm2, %v1534_v24  ;;  %v1544_v26 = vshrl.u32 %v1534_v24, 16  ;;  %v1660_v28 = vrot.slane %v1534_v24, 1 }
 0x603   : > { %2261 = vmatprep.mubr.msk.bf16.mxu1 %vm2468_vm0, %v2467_v1  ;;  %2258 = vmatpush3.bf16.msra.mxu1 %v2354_v29 }
 0x604   : > { %2238 = vmatmul.mubr.msk.bf16.vlgmr.msra.gmra.mrb[36].mxu0 %vm384_vm2, %v1544_v26  ;;  %2259 = vmatprep.subr.bf16.mxu1 %v2467_v1 }
 0x605   : > { %2250 = vmatpush3.bf16.msra.mxu0 %v2352_v25  ;;  %2253 = vmatprep.mubr.msk.bf16.mxu0 %vm2468_vm0, %v2467_v1 }
 0x606   : > { %2251 = vmatprep.subr.bf16.mxu0 %v2467_v1 }
 0x607   : > { %2260 = vmatpush3.bf16.msra.mxu1 %v2355_v30 }
 0x609   : > { %2252 = vmatpush3.bf16.msra.mxu0 %v2353_v27 }
 0x60c   : > { %2254 = vmatmul.mubr.msk.bf16.vlgmr.msra.gmra.mrb[40].mxu0 %vm384_vm2, %v1660_v28 }
 0x6d5   : > { %v1649_v31 = vpop.f32.mrb[36].mxu1 }
 0x6d6   : > { %v2247_v32 = vpop.f32.mrb[37].mxu1 }
 0x6d7   : > { %v1595_v33 = vpop.f32.mrb[36].mxu0  ;;  %v1652_v34 = vpop.f32.mrb[38].mxu1 }
 0x6d8   : > { %v1650_v35 = vadd.f32 %v1649_v31, %v1595_v33  ;;  %v2239_v36 = vpop.f32.mrb[37].mxu0  ;;  %v2248_v37 = vpop.f32.mrb[39].mxu1 }
 0x6d9   : > { %v1598_v38 = vpop.f32.mrb[38].mxu0 }
 0x6da   : > { %v2240_v39 = vpop.f32.mrb[39].mxu0 }
 0x6df   : > { %v1710_v40 = vpop.f32.mrb[40].mxu0 }
 0x6e0   : > { %v1716_v41 = vadd.f32 %v1710_v40, %v1650_v35  ;;  %v2255_v42 = vpop.f32.mrb[41].mxu0 }
 0x6e1   : > { %v1713_v1 = vpop.f32.mrb[42].mxu0 }
 0x6e2   : > { %v1717_v43 = vadd.f32 %v1716_v41, %v2714_v13  ;;  %v2256_v44 = vpop.f32.mrb[43].mxu0 }
 0x6e4   : > { %v1718_v45 = vadd.f32 %v1717_v43, %v2835_v58 }
 0x6e6   : > { %v1720_v46 = vpack.c.bf16 %v1718_v45, %v1718_v45  ;;  %1719 = vst.msk [vmem:[%s299_s15] sm:$0x1] %vm306_vm1, %v1718_v45 }
 0x6e8   : > { %2262 = vmatmul.mubr.msk.bf16.vlgmr.msra.gmra.mrb[40].mxu1 %vm384_vm2, %v1720_v46 }
 0x6e9   : > { %2381 = shalt.err (!%p2378_p7)
}
 0x6ea   : > { %s2382_s8 = scalar_lea.hbm %s2909_s27, 16  ;;  %s2386_s24 = scalar_lea.hbm %s2990_s9, 32 }
 0x6eb   : > { %p2383_p8 = scmp.ne.s32.totalorder %s2909_s27, %s2382_s8  ;;  %p2387_p13 = scmp.lt.u32.totalorder %s2909_s27, %s2990_s9 }
 0x6ec   : > { %p2388_p0 = scmp.lt.u32.totalorder %s2386_s24, %s2382_s8  ;;  %p2390_p2 = scmp.lt.u32.totalorder %s2382_s8, %s2909_s27 }
 0x6ed   : > { %p2384_p9 = pnand %p2383_p8, %p2562_p10 }
 0x6ee   : > { %p2389_p1 = por %p2388_p0, %p2387_p13 }
 0x6ef   : > { %p2385_p12 = pneg %p2384_p9 }
 0x6f0   : > { %p2391_p3 = por %p2390_p2, %p2389_p1 }
 0x6f2   : > { %p2392_p4 = pnand %p2391_p3, %p2385_p12 }
 0x6f4   : > { %2395 = shalt.err (!%p2392_p4)
}
 0x6f5   : > { %2266 = dma.vmem_to_hbm [thread:$0]  (%p2562_p10), %s1814_s13, 16, %s2909_s27, %s1788_s30   ;;  %vm1781_vm5 = vcmask 24576  }
 0x6f6   : > { %s3008_s18 = sld [smem:[#allocation19_spill]]  ;;  %s293_s15 = scalar_lea.vmem [#allocation6], %s2896_s7 }
 0x6f7   : > { %s1800_s20 = sshll.u32 %s293_s15, 4  ;;  %s3009_s11 = sld [smem:[#allocation20_spill]]  ;;  %s2940_s20 = int_to_ptr.vmem [resolvable:$true] %s1800_s20 }
 0x6f8   : > { %s1784_s27 = scalar_lea.sflag [#allocation7], %s2896_s7  ;;  %s2396_s13 = scalar_lea.vmem %s2940_s20, 16 }
 0x6f9   : > { %p2397_p5 = scmp.ne.s32.totalorder %s2940_s20, %s2396_s13  ;;  %s2470_s17 = smov [#allocation6]  }
 0x6fa   : > { %s2400_s30 = sshll.u32 %s2470_s17, 4  ;;  %s2401_s30 = int_to_ptr.vmem [resolvable:$false] %s2400_s30 }
 0x6fb   : > { %p2398_p6 = pnand %p2397_p5, %p2562_p10  ;;  %s2402_s14 = scalar_lea.vmem %s2401_s30, 32 }
 0x6fc   : > { %v1725_v13 = vld [vmem:[%s3008_s18] sm:$0x1]  ;;  %p2403_p8 = scmp.lt.s32.totalorder %s2940_s20, %s2401_s30  ;;  %p2404_p9 = scmp.lt.s32.totalorder %s2402_s14, %s2396_s13 }
 0x6fd   : > { %s2938_s12 = scalar_lea.hbm %s3009_s11, %s2019_s22  ;;  %p2399_p7 = pneg %p2398_p6 }
 0x6fe   : > { %p2405_p12 = por %p2404_p9, %p2403_p8 }
 0x700   : > { %p2406_p13 = pnand %p2405_p12, %p2399_p7 }
 0x7bb   : > { %v1775_v47 = vpop.f32.mrb[40].mxu1 }
 0x7bc   : > { %v1776_v48 = vadd.f32 %v1775_v47, %v1725_v13  ;;  %v2263_v49 = vpop.f32.mrb[41].mxu1 }
 0x7bd   : > { %v1778_v50 = vpop.f32.mrb[42].mxu1 }
 0x7be   : > { %v2264_v51 = vpop.f32.mrb[43].mxu1  ;;  %1782 = vst.msk [vmem:[%s293_s15] sm:$0x1] %vm1781_vm5, %v1776_v48 }
 0x7bf   : > { %2409 = shalt.err (!%p2406_p13)
}
 0x7c0   : > { %s2410_s7 = scalar_lea.hbm %s2938_s12, 16  ;;  %s2414_s16 = scalar_lea.hbm %s3009_s11, 32 }
 0x7c1   : > { %p2411_p0 = scmp.ne.s32.totalorder %s2938_s12, %s2410_s7  ;;  %p2415_p3 = scmp.lt.u32.totalorder %s2938_s12, %s3009_s11 }
 0x7c2   : > { %p2416_p4 = scmp.lt.u32.totalorder %s2414_s16, %s2410_s7  ;;  %p2418_p6 = scmp.lt.u32.totalorder %s2410_s7, %s2938_s12 }
 0x7c3   : > { %p2412_p1 = pnand %p2411_p0, %p2562_p10 }
 0x7c4   : > { %p2417_p5 = por %p2416_p4, %p2415_p3 }
 0x7c5   : > { %p2413_p2 = pneg %p2412_p1 }
 0x7c6   : > { %p2419_p7 = por %p2418_p6, %p2417_p5 }
 0x7c8   : > { %p2420_p8 = pnand %p2419_p7, %p2413_p2 }
 0x7ca   : > { %2423 = shalt.err (!%p2420_p8)
}
 0x7cb   : > { %2265 = dma.vmem_to_hbm [thread:$0]  (%p2562_p10), %s2940_s20, 16, %s2938_s12, %s1784_s27  }
 0x7cc PF: > { %s3010_s21 = sld [smem:[#allocation15_spill]]  ;;  %s3011_s25 = sld [smem:[#allocation13_spill]] }
 0x7d2   : > { %p2276_p9 = scmp.ge.s32.totalorder %s3010_s21, 2  ;;  %s1825_s29 = sand.u32 1, %s3011_s25  }
 0x7d3   : > { %s1826_s18 = scalar_lea.sflag [#allocation7], %s1825_s29 }
 0x7d4   : > { %p2270_p12 = pnand %p2276_p9, %p2566_p11 }
 0x7d6   : > { %2443 = dma.done.wait (!%p2270_p12), %s1826_s18, 16  }
 0x7d7   : > { %2445 = vsyncadd (!%p2270_p12), %s1826_s18, 4294967280  ;;  %s1834_s15 = scalar_lea.sflag [#allocation9], %s1825_s29 }
 0x7d8   : > { %2447 = dma.done.wait (!%p2270_p12), %s1834_s15, 16  }
 0x7d9   : > { %2449 = vsyncadd (!%p2270_p12), %s1834_s15, 4294967280  ;;  %s3013_s16 = sld [smem:[#allocation16_spill]]  ;;  %s3014_s23 = sld [smem:[#allocation14_spill]] }
 0x7da   : > { %s3015_s15 = sld [smem:[#allocation17_spill]]  ;;  %s3016_s14 = smov %s2456_s0 }
 0x7df   : > { %p29_p10 = scmp.ge.s32.totalorder %s3013_s16, 4   ;;  %s3017_s0 = smov %s3014_s23 }
 0x7e1   :  { %31 = sbr.rel (!%p29_p10) target bundleno = 21 (0x15), region = 112 }
 0x7e8   :  { %1838 = vsyncpa [#allocation7], 1 }
 0x7e9   :  { %1840 = vsyncpa [#allocation7 + $0x1], 1 }
 0x7ea   :  { %1841 = vsyncpa [#allocation9], 1 }
 0x7eb   :  { %1843 = vsyncpa [#allocation9 + $0x1], 1 }

</bundles_post_ra>
